<compile_context>
chip_gen: v5e
topology: v5e:2x2
jax: 0.10.0
libtpu: 0.0.40
codegen_flags: <defaults>
</compile_context>

<pallas_src>
import numpy as np
import jax
import jax.numpy as jnp
from jax.experimental import pallas as pl
from jax.experimental.pallas import tpu as pltpu


# ----------------------------- Pallas kernel --------------------------------

def sasrec_kernel(x2d_ref, xlast_ref, mlast_ref, cand_ref,
                  wq_ref, wkv_ref, w1_ref, w2_ref,
                  pvec_ref, bkv_ref, out_ref):
    TB, D = xlast_ref.shape
    L = x2d_ref.shape[0] // TB

    pv = pvec_ref[...]                      # (9, D) f32 packed small params
    g1, be1 = pv[0:1], pv[1:2]
    g2, be2 = pv[2:3], pv[3:4]
    g3, be3 = pv[4:5], pv[5:6]
    bq, bh1, bh2 = pv[6:7], pv[7:8], pv[8:9]

    def layernorm(v, g, b, eps=1e-5):
        mu = jnp.mean(v, axis=-1, keepdims=True)
        var = jnp.mean(jnp.square(v - mu), axis=-1, keepdims=True)
        return (v - mu) * jax.lax.rsqrt(var + eps) * g + b

    # ---- fused K/V projection over all TB*L positions (single MXU matmul) ----
    kv = jnp.dot(x2d_ref[...], wkv_ref[...],
                 preferred_element_type=jnp.float32) + bkv_ref[...]   # (TB*L, 2D)
    kv3 = kv.reshape(TB, L, 2 * D)
    k3 = kv3[:, :, :D]                                                # (TB, L, D)
    v3 = kv3[:, :, D:]                                                # (TB, L, D)

    # ---- query path: last sequence position only (causal mask is a no-op) ----
    xl = layernorm(xlast_ref[...], g1, be1)                           # (TB, D) f32
    q = jnp.dot(xl.astype(jnp.bfloat16), wq_ref[...],
                preferred_element_type=jnp.float32) + bq              # (TB, D)

    scale = jnp.float32(1.0 / (D ** 0.5))
    scores = jnp.sum(q[:, None, :] * k3, axis=-1) * scale             # (TB, L)
    mx = jnp.max(scores, axis=-1, keepdims=True)
    e = jnp.exp(scores - mx)
    den = jnp.sum(e, axis=-1, keepdims=True)
    attn = e * pl.reciprocal(den, approx=True)                        # (TB, L)
    attn_out = jnp.sum(attn[:, :, None] * v3, axis=1) + xl            # (TB, D)

    # ---- position-wise FFN (conv1x1 == linear) at the last position ----
    y = layernorm(attn_out, g2, be2)
    h = jnp.maximum(
        jnp.dot(y.astype(jnp.bfloat16), w1_ref[...],
                preferred_element_type=jnp.float32) + bh1, 0.0)
    ff = jnp.dot(h.astype(jnp.bfloat16), w2_ref[...],
                 preferred_element_type=jnp.float32) + bh2 + y
    ff = ff * mlast_ref[...]                                          # last-pos mask
    ff = layernorm(ff, g3, be3)                                       # (TB, D)

    # ---- candidate logits (target + negatives, lane-dense padded) ----
    cand = cand_ref[...].astype(jnp.float32)                          # (TB, NC, D)
    out_ref[...] = jnp.sum(ff[:, None, :] * cand, axis=-1)            # (TB, NC)


# ------------------------------ host wrapper --------------------------------

def _pick_tb(batch, seq_len, d, ncpad):
    """Pick the per-step batch block TB.

    Goals: (a) feed >=128 rows into the fused K/V matmul, (b) use large tiles
    so the auto-pipelined HBM stream runs near roofline and the ~0.35 us/step
    grid overhead amortizes, (c) stay well inside the double-buffered VMEM
    budget, (d) don't pad a tiny batch far past one block of useful work.
    """
    stream_bytes_per_row = (
        seq_len * d * 2          # x2d (bf16)
        + d * 4 + 4              # xlast + mlast (f32)
        + ncpad * d * 2          # candidates (bf16)
        + ncpad * 4)             # logits out (f32)
    budget = 4 * 1024 * 1024     # per pipeline buffer (x2 for double buffering)

    tb = 8
    # Reach an MXU-friendly row count even for small batches.
    while (tb * seq_len < 128 and tb < 64
           and (2 * tb) * stream_bytes_per_row <= budget):
        tb *= 2
    # Keep growing while the batch fills the blocks and VMEM allows it.
    while (tb < 128 and 2 * tb <= batch
           and (2 * tb) * stream_bytes_per_row <= budget):
        tb *= 2
    # Avoid over-padding tiny batches.
    while tb > 8 and tb >= 2 * batch:
        tb //= 2
    return tb


def sasrec_forward(params, seq, seq_mask, tgt_vid, neg_vids):
    B, L = seq.shape
    N = neg_vids.shape[1]
    D = params["vid_emb"].shape[1]

    vid = params["vid_emb"]
    pos = params["pos_emb"]

    # Embedding gathers + position add + padding mask fused in XLA glue.
    maskf = (seq_mask != 0).astype(jnp.float32)                        # (B, L)
    x = (vid[seq] + pos[None, :, :]) * maskf[:, :, None]               # (B, L, D)
    xlast = x[:, L - 1, :]                                             # (B, D)
    mlast = maskf[:, L - 1:L]                                          # (B, 1)

    # Candidates: [target | negatives], padded lane-dense to a multiple of 128.
    NC = N + 1
    NCpad = ((NC + 127) // 128) * 128

    # Batch blocking (VMEM- and batch-aware).
    TB = _pick_tb(B, L, D, NCpad)
    G = pl.cdiv(B, TB)
    Bp = G * TB
    pad = Bp - B

    bf16 = jnp.bfloat16
    x2d = jnp.pad(x.reshape(B * L, D), ((0, pad * L), (0, 0))).astype(bf16)
    xlast = jnp.pad(xlast, ((0, pad), (0, 0)))
    mlast = jnp.pad(mlast, ((0, pad), (0, 0)))
    cand = jnp.concatenate([vid[tgt_vid][:, None, :], vid[neg_vids]], axis=1)
    cand = jnp.pad(cand, ((0, pad), (0, NCpad - NC), (0, 0))).astype(bf16)

    # Packed / fused parameters (grid-invariant -> stay resident in VMEM).
    wq = params["wq"].astype(bf16)
    wkv = jnp.concatenate([params["wk"], params["wv"]], axis=1).astype(bf16)
    w1 = params["w1"].astype(bf16)
    w2 = params["w2"].astype(bf16)
    bkv = jnp.concatenate([params["bk"], params["bv"]], axis=1)        # (1, 2D)
    pvec = jnp.concatenate(
        [params["ln1_g"], params["ln1_b"],
         params["ln2_g"], params["ln2_b"],
         params["ln3_g"], params["ln3_b"],
         params["bq"], params["b1"], params["b2"]], axis=0)            # (9, D)

    def full_spec(shape):
        return pl.BlockSpec(shape, lambda b, n=len(shape): (0,) * n)

    in_specs = [
        pl.BlockSpec((TB * L, D), lambda b: (b, 0)),        # x2d (bf16)
        pl.BlockSpec((TB, D), lambda b: (b, 0)),            # xlast (f32)
        pl.BlockSpec((TB, 1), lambda b: (b, 0)),            # mlast (f32)
        pl.BlockSpec((TB, NCpad, D), lambda b: (b, 0, 0)),  # candidates (bf16)
        full_spec((D, D)),                                  # wq
        full_spec((D, 2 * D)),                              # wkv
        full_spec((D, D)),                                  # w1
        full_spec((D, D)),                                  # w2
        full_spec((9, D)),                                  # packed LN/bias vecs
        full_spec((1, 2 * D)),                              # bkv
    ]
    out_specs = pl.BlockSpec((TB, NCpad), lambda b: (b, 0))
    out_shape = jax.ShapeDtypeStruct((Bp, NCpad), jnp.float32)

    logits = pl.pallas_call(
        sasrec_kernel,
        out_shape=out_shape,
        grid_spec=pltpu.PrefetchScalarGridSpec(
            num_scalar_prefetch=0,
            grid=(G,),
            in_specs=in_specs,
            out_specs=out_specs,
        ),
        compiler_params=pltpu.CompilerParams(
            dimension_semantics=("parallel",),
            vmem_limit_bytes=32 * 1024 * 1024),
    )(x2d, xlast, mlast, cand, wq, wkv, w1, w2, pvec, bkv)

    tgt_logits = logits[:B, 0]
    neg_logits = logits[:B, 1:1 + N].reshape(B * N)
    return tgt_logits, neg_logits


# ------------------------- pure-JAX reference (check) -----------------------

def sasrec_reference(params, seq, seq_mask, tgt_vid, neg_vids):
    vid = params["vid_emb"]
    B, L = seq.shape
    D = vid.shape[1]
    seq_emb = vid[seq] + params["pos_emb"][None]
    mask = (seq_mask != 0).astype(jnp.float32)[:, :, None]
    seq_emb = seq_emb * mask

    def ln(x, g, b):
        mu = jnp.mean(x, -1, keepdims=True)
        var = jnp.mean((x - mu) ** 2, -1, keepdims=True)
        return (x - mu) / jnp.sqrt(var + 1e-5) * g + b

    x_ln = ln(seq_emb, params["ln1_g"], params["ln1_b"])
    q = x_ln @ params["wq"] + params["bq"]
    k = seq_emb @ params["wk"] + params["bk"]
    v = seq_emb @ params["wv"] + params["bv"]
    scores = jnp.einsum("bqd,bkd->bqk", q, k) / (D ** 0.5)
    causal = jnp.tril(jnp.ones((L, L), jnp.float32))
    scores = jnp.where(causal[None] == 0, jnp.float32(-1e9), scores)
    attn = jax.nn.softmax(scores, axis=-1)
    attn_out = jnp.einsum("bqk,bkd->bqd", attn, v) + x_ln
    y = ln(attn_out, params["ln2_g"], params["ln2_b"])
    h = jnp.maximum(y @ params["w1"] + params["b1"], 0.0)
    ff = h @ params["w2"] + params["b2"] + y
    ff = ff * mask
    ff = ln(ff, params["ln3_g"], params["ln3_b"])
    final = ff[:, -1, :]
    tgt_logits = jnp.sum(final * vid[tgt_vid], axis=1)
    neg_logits = jnp.einsum("bd,bnd->bn", final, vid[neg_vids]).reshape(-1)
    return tgt_logits, neg_logits


# ----------------------------------- main ------------------------------------

def init_params(key, vocab, L, D):
    ks = jax.random.split(key, 8)
    vid = jax.random.normal(ks[0], (vocab, D), jnp.float32) * 0.1
    vid = vid.at[0].set(0.0)                      # padding_idx = 0
    pos = jax.random.normal(ks[1], (L, D), jnp.float32) * 0.1

    def lin(k, din, dout):
        kw, kb = jax.random.split(k)
        bound = 1.0 / np.sqrt(din)
        w = jax.random.uniform(kw, (din, dout), jnp.float32, -bound, bound)
        b = jax.random.uniform(kb, (1, dout), jnp.float32, -bound, bound)
        return w, b

    wq, bq = lin(ks[2], D, D)
    wk, bk = lin(ks[3], D, D)
    wv, bv = lin(ks[4], D, D)
    w1, b1 = lin(ks[5], D, D)                     # Conv1d(D, D, 1), pre-transposed
    w2, b2 = lin(ks[6], D, D)

    ones = jnp.ones((1, D), jnp.float32)
    zeros = jnp.zeros((1, D), jnp.float32)
    return dict(
        vid_emb=vid, pos_emb=pos,
        ln1_g=ones, ln1_b=zeros, ln2_g=ones, ln2_b=zeros, ln3_g=ones, ln3_b=zeros,
        wq=wq, bq=bq, wk=wk, bk=bk, wv=wv, bv=bv,
        w1=w1, b1=b1, w2=w2, b2=b2,
    )


if __name__ == "__main__":
    B, L, D, N = 2, 8, 32, 4
    vocab = 50 + 2                                # id_cnt_dict['video_id'] + 2

    root = jax.random.PRNGKey(0)
    kp, ks, km, kt, kn = jax.random.split(root, 5)
    params = init_params(kp, vocab, L, D)

    seq = jax.random.randint(ks, (B, L), 1, vocab, dtype=jnp.int32)
    seq_mask = (jax.random.uniform(km, (B, L)) > 0.25).astype(jnp.int32)
    tgt_vid = jax.random.randint(kt, (B,), 1, vocab, dtype=jnp.int32)
    neg_vids = jax.random.randint(kn, (B, N), 1, vocab, dtype=jnp.int32)

    tgt_logits, neg_logits = sasrec_forward(params, seq, seq_mask, tgt_vid, neg_vids)
    jax.block_until_ready((tgt_logits, neg_logits))

    ref_tgt, ref_neg = sasrec_reference(params, seq, seq_mask, tgt_vid, neg_vids)
    np.testing.assert_allclose(np.asarray(tgt_logits), np.asarray(ref_tgt),
                               rtol=2e-2, atol=2e-2)
    np.testing.assert_allclose(np.asarray(neg_logits), np.asarray(ref_neg),
                               rtol=2e-2, atol=2e-2)
    assert tgt_logits.shape == (B,) and neg_logits.shape == (B * N,)
    print("KERNEL_OK")
</pallas_src>

<mosaic_0001>
module attributes {stable_mosaic.version = 11 : i64} {
  func.func @sasrec_kernel(%arg0: i32, %arg1: memref<64x32xbf16, #tpu.memory_space<vmem>>, %arg2: memref<8x32xf32, #tpu.memory_space<vmem>>, %arg3: memref<8x1xf32, #tpu.memory_space<vmem>>, %arg4: memref<8x128x32xbf16, #tpu.memory_space<vmem>>, %arg5: memref<32x32xbf16, #tpu.memory_space<vmem>>, %arg6: memref<32x64xbf16, #tpu.memory_space<vmem>>, %arg7: memref<32x32xbf16, #tpu.memory_space<vmem>>, %arg8: memref<32x32xbf16, #tpu.memory_space<vmem>>, %arg9: memref<9x32xf32, #tpu.memory_space<vmem>>, %arg10: memref<1x64xf32, #tpu.memory_space<vmem>>, %arg11: memref<8x128xf32, #tpu.memory_space<vmem>>) attributes {dimension_semantics = [#tpu.dimension_semantics<parallel>], iteration_bounds = array<i64: 1>, scalar_prefetch = 0 : i64, scratch_operands = 0 : i64, tpu.core_type = #tpu.core_type<tc>, window_params = [{transform_indices = @transform_0, window_bounds = array<i64: 64, 32>}, {transform_indices = @transform_1, window_bounds = array<i64: 8, 32>}, {transform_indices = @transform_2, window_bounds = array<i64: 8, 1>}, {transform_indices = @transform_3, window_bounds = array<i64: 8, 128, 32>}, {pipeline_mode = #tpu.pipeline_mode<synchronous>, transform_indices = @transform_4, window_bounds = array<i64: 32, 32>}, {pipeline_mode = #tpu.pipeline_mode<synchronous>, transform_indices = @transform_5, window_bounds = array<i64: 32, 64>}, {pipeline_mode = #tpu.pipeline_mode<synchronous>, transform_indices = @transform_6, window_bounds = array<i64: 32, 32>}, {pipeline_mode = #tpu.pipeline_mode<synchronous>, transform_indices = @transform_7, window_bounds = array<i64: 32, 32>}, {pipeline_mode = #tpu.pipeline_mode<synchronous>, transform_indices = @transform_8, window_bounds = array<i64: 9, 32>}, {pipeline_mode = #tpu.pipeline_mode<synchronous>, transform_indices = @transform_9, window_bounds = array<i64: 1, 64>}, {transform_indices = @transform_10, window_bounds = array<i64: 8, 128>}]} {
    %c0 = arith.constant 0 : index
    %c0_0 = arith.constant 0 : index
    %0 = vector.load %arg9[%c0, %c0_0] : memref<9x32xf32, #tpu.memory_space<vmem>>, vector<9x32xf32>
    %1 = vector.extract_strided_slice %0 {offsets = [0, 0], sizes = [1, 32], strides = [1, 1]} : vector<9x32xf32> to vector<1x32xf32>
    %2 = vector.extract_strided_slice %0 {offsets = [1, 0], sizes = [1, 32], strides = [1, 1]} : vector<9x32xf32> to vector<1x32xf32>
    %3 = vector.extract_strided_slice %0 {offsets = [2, 0], sizes = [1, 32], strides = [1, 1]} : vector<9x32xf32> to vector<1x32xf32>
    %4 = vector.extract_strided_slice %0 {offsets = [3, 0], sizes = [1, 32], strides = [1, 1]} : vector<9x32xf32> to vector<1x32xf32>
    %5 = vector.extract_strided_slice %0 {offsets = [4, 0], sizes = [1, 32], strides = [1, 1]} : vector<9x32xf32> to vector<1x32xf32>
    %6 = vector.extract_strided_slice %0 {offsets = [5, 0], sizes = [1, 32], strides = [1, 1]} : vector<9x32xf32> to vector<1x32xf32>
    %7 = vector.extract_strided_slice %0 {offsets = [6, 0], sizes = [1, 32], strides = [1, 1]} : vector<9x32xf32> to vector<1x32xf32>
    %8 = vector.extract_strided_slice %0 {offsets = [7, 0], sizes = [1, 32], strides = [1, 1]} : vector<9x32xf32> to vector<1x32xf32>
    %9 = vector.extract_strided_slice %0 {offsets = [8, 0], sizes = [1, 32], strides = [1, 1]} : vector<9x32xf32> to vector<1x32xf32>
    %c0_1 = arith.constant 0 : index
    %c0_2 = arith.constant 0 : index
    %10 = vector.load %arg1[%c0_1, %c0_2] : memref<64x32xbf16, #tpu.memory_space<vmem>>, vector<64x32xbf16>
    %c0_3 = arith.constant 0 : index
    %c0_4 = arith.constant 0 : index
    %11 = vector.load %arg6[%c0_3, %c0_4] : memref<32x64xbf16, #tpu.memory_space<vmem>>, vector<32x64xbf16>
    %cst = arith.constant dense<0.000000e+00> : vector<64x64xf32>
    %12 = tpu.matmul %10, %11, %cst {dimension_numbers = #tpu.dot_dimension_numbers<[1], [0], [0], [1], [0, 0, 1, 1], [], []>} : vector<64x32xbf16>, vector<32x64xbf16>, vector<64x64xf32> -> vector<64x64xf32>
    %c0_5 = arith.constant 0 : index
    %c0_6 = arith.constant 0 : index
    %13 = vector.load %arg10[%c0_5, %c0_6] : memref<1x64xf32, #tpu.memory_space<vmem>>, vector<1x64xf32>
    %14 = vector.broadcast %13 : vector<1x64xf32> to vector<64x64xf32>
    %15 = arith.addf %12, %14 : vector<64x64xf32>
    %16 = vector.shape_cast %15 : vector<64x64xf32> to vector<8x8x64xf32>
    %17 = vector.extract_strided_slice %16 {offsets = [0, 0, 0], sizes = [8, 8, 32], strides = [1, 1, 1]} : vector<8x8x64xf32> to vector<8x8x32xf32>
    %18 = vector.extract_strided_slice %16 {offsets = [0, 0, 32], sizes = [8, 8, 32], strides = [1, 1, 1]} : vector<8x8x64xf32> to vector<8x8x32xf32>
    %c0_7 = arith.constant 0 : index
    %c0_8 = arith.constant 0 : index
    %19 = vector.load %arg2[%c0_7, %c0_8] : memref<8x32xf32, #tpu.memory_space<vmem>>, vector<8x32xf32>
    %cst_9 = arith.constant dense<0.000000e+00> : vector<8xf32>
    %20 = vector.multi_reduction <add>, %19, %cst_9 [1] : vector<8x32xf32> to vector<8xf32>
    %21 = vector.shape_cast %20 : vector<8xf32> to vector<8x1xf32>
    %cst_10 = arith.constant 3.200000e+01 : f32
    %22 = vector.broadcast %cst_10 : f32 to vector<8x1xf32>
    %23 = arith.divf %21, %22 : vector<8x1xf32>
    %24 = vector.broadcast %23 : vector<8x1xf32> to vector<8x32xf32>
    %25 = arith.subf %19, %24 : vector<8x32xf32>
    %26 = arith.mulf %25, %25 : vector<8x32xf32>
    %cst_11 = arith.constant dense<0.000000e+00> : vector<8xf32>
    %27 = vector.multi_reduction <add>, %26, %cst_11 [1] : vector<8x32xf32> to vector<8xf32>
    %28 = vector.shape_cast %27 : vector<8xf32> to vector<8x1xf32>
    %cst_12 = arith.constant 3.200000e+01 : f32
    %29 = vector.broadcast %cst_12 : f32 to vector<8x1xf32>
    %30 = arith.divf %28, %29 : vector<8x1xf32>
    %31 = vector.broadcast %23 : vector<8x1xf32> to vector<8x32xf32>
    %32 = arith.subf %19, %31 : vector<8x32xf32>
    %cst_13 = arith.constant 9.99999974E-6 : f32
    %33 = vector.broadcast %cst_13 : f32 to vector<8x1xf32>
    %34 = arith.addf %30, %33 : vector<8x1xf32>
    %35 = math.rsqrt %34 : vector<8x1xf32>
    %36 = vector.broadcast %35 : vector<8x1xf32> to vector<8x32xf32>
    %37 = arith.mulf %32, %36 : vector<8x32xf32>
    %38 = vector.broadcast %1 : vector<1x32xf32> to vector<8x32xf32>
    %39 = arith.mulf %37, %38 : vector<8x32xf32>
    %40 = vector.broadcast %2 : vector<1x32xf32> to vector<8x32xf32>
    %41 = arith.addf %39, %40 : vector<8x32xf32>
    %42 = arith.truncf %41 : vector<8x32xf32> to vector<8x32xbf16>
    %c0_14 = arith.constant 0 : index
    %c0_15 = arith.constant 0 : index
    %43 = vector.load %arg5[%c0_14, %c0_15] : memref<32x32xbf16, #tpu.memory_space<vmem>>, vector<32x32xbf16>
    %cst_16 = arith.constant dense<0.000000e+00> : vector<8x32xf32>
    %44 = tpu.matmul %42, %43, %cst_16 {dimension_numbers = #tpu.dot_dimension_numbers<[1], [0], [0], [1], [0, 0, 1, 1], [], []>} : vector<8x32xbf16>, vector<32x32xbf16>, vector<8x32xf32> -> vector<8x32xf32>
    %45 = vector.broadcast %7 : vector<1x32xf32> to vector<8x32xf32>
    %46 = arith.addf %44, %45 : vector<8x32xf32>
    %47 = vector.shape_cast %46 : vector<8x32xf32> to vector<8x1x32xf32>
    %48 = vector.broadcast %47 : vector<8x1x32xf32> to vector<8x8x32xf32>
    %49 = arith.mulf %48, %17 : vector<8x8x32xf32>
    %cst_17 = arith.constant dense<0.000000e+00> : vector<8x8xf32>
    %50 = vector.multi_reduction <add>, %49, %cst_17 [2] : vector<8x8x32xf32> to vector<8x8xf32>
    %cst_18 = arith.constant 0.176776692 : f32
    %51 = vector.broadcast %cst_18 : f32 to vector<8x8xf32>
    %52 = arith.mulf %50, %51 : vector<8x8xf32>
    %cst_19 = arith.constant dense<0xFF800000> : vector<8xf32>
    %53 = vector.multi_reduction <maximumf>, %52, %cst_19 [1] : vector<8x8xf32> to vector<8xf32>
    %54 = vector.shape_cast %53 : vector<8xf32> to vector<8x1xf32>
    %55 = vector.broadcast %54 : vector<8x1xf32> to vector<8x8xf32>
    %56 = arith.subf %52, %55 : vector<8x8xf32>
    %57 = math.exp %56 : vector<8x8xf32>
    %cst_20 = arith.constant dense<0.000000e+00> : vector<8xf32>
    %58 = vector.multi_reduction <add>, %57, %cst_20 [1] : vector<8x8xf32> to vector<8xf32>
    %59 = vector.shape_cast %58 : vector<8xf32> to vector<8x1xf32>
    %60 = tpu.reciprocal %59 {approx = true} : vector<8x1xf32> -> vector<8x1xf32>
    %61 = vector.broadcast %60 : vector<8x1xf32> to vector<8x8xf32>
    %62 = arith.mulf %57, %61 : vector<8x8xf32>
    %63 = vector.shape_cast %62 : vector<8x8xf32> to vector<8x8x1xf32>
    %64 = vector.broadcast %63 : vector<8x8x1xf32> to vector<8x8x32xf32>
    %65 = arith.mulf %64, %18 : vector<8x8x32xf32>
    %cst_21 = arith.constant dense<0.000000e+00> : vector<8x32xf32>
    %66 = vector.multi_reduction <add>, %65, %cst_21 [1] : vector<8x8x32xf32> to vector<8x32xf32>
    %67 = arith.addf %66, %41 : vector<8x32xf32>
    %cst_22 = arith.constant dense<0.000000e+00> : vector<8xf32>
    %68 = vector.multi_reduction <add>, %67, %cst_22 [1] : vector<8x32xf32> to vector<8xf32>
    %69 = vector.shape_cast %68 : vector<8xf32> to vector<8x1xf32>
    %cst_23 = arith.constant 3.200000e+01 : f32
    %70 = vector.broadcast %cst_23 : f32 to vector<8x1xf32>
    %71 = arith.divf %69, %70 : vector<8x1xf32>
    %72 = vector.broadcast %71 : vector<8x1xf32> to vector<8x32xf32>
    %73 = arith.subf %67, %72 : vector<8x32xf32>
    %74 = arith.mulf %73, %73 : vector<8x32xf32>
    %cst_24 = arith.constant dense<0.000000e+00> : vector<8xf32>
    %75 = vector.multi_reduction <add>, %74, %cst_24 [1] : vector<8x32xf32> to vector<8xf32>
    %76 = vector.shape_cast %75 : vector<8xf32> to vector<8x1xf32>
    %cst_25 = arith.constant 3.200000e+01 : f32
    %77 = vector.broadcast %cst_25 : f32 to vector<8x1xf32>
    %78 = arith.divf %76, %77 : vector<8x1xf32>
    %79 = vector.broadcast %71 : vector<8x1xf32> to vector<8x32xf32>
    %80 = arith.subf %67, %79 : vector<8x32xf32>
    %cst_26 = arith.constant 9.99999974E-6 : f32
    %81 = vector.broadcast %cst_26 : f32 to vector<8x1xf32>
    %82 = arith.addf %78, %81 : vector<8x1xf32>
    %83 = math.rsqrt %82 : vector<8x1xf32>
    %84 = vector.broadcast %83 : vector<8x1xf32> to vector<8x32xf32>
    %85 = arith.mulf %80, %84 : vector<8x32xf32>
    %86 = vector.broadcast %3 : vector<1x32xf32> to vector<8x32xf32>
    %87 = arith.mulf %85, %86 : vector<8x32xf32>
    %88 = vector.broadcast %4 : vector<1x32xf32> to vector<8x32xf32>
    %89 = arith.addf %87, %88 : vector<8x32xf32>
    %90 = arith.truncf %89 : vector<8x32xf32> to vector<8x32xbf16>
    %c0_27 = arith.constant 0 : index
    %c0_28 = arith.constant 0 : index
    %91 = vector.load %arg7[%c0_27, %c0_28] : memref<32x32xbf16, #tpu.memory_space<vmem>>, vector<32x32xbf16>
    %cst_29 = arith.constant dense<0.000000e+00> : vector<8x32xf32>
    %92 = tpu.matmul %90, %91, %cst_29 {dimension_numbers = #tpu.dot_dimension_numbers<[1], [0], [0], [1], [0, 0, 1, 1], [], []>} : vector<8x32xbf16>, vector<32x32xbf16>, vector<8x32xf32> -> vector<8x32xf32>
    %93 = vector.broadcast %8 : vector<1x32xf32> to vector<8x32xf32>
    %94 = arith.addf %92, %93 : vector<8x32xf32>
    %cst_30 = arith.constant 0.000000e+00 : f32
    %95 = vector.broadcast %cst_30 : f32 to vector<8x32xf32>
    %96 = arith.maximumf %94, %95 : vector<8x32xf32>
    %97 = arith.truncf %96 : vector<8x32xf32> to vector<8x32xbf16>
    %c0_31 = arith.constant 0 : index
    %c0_32 = arith.constant 0 : index
    %98 = vector.load %arg8[%c0_31, %c0_32] : memref<32x32xbf16, #tpu.memory_space<vmem>>, vector<32x32xbf16>
    %cst_33 = arith.constant dense<0.000000e+00> : vector<8x32xf32>
    %99 = tpu.matmul %97, %98, %cst_33 {dimension_numbers = #tpu.dot_dimension_numbers<[1], [0], [0], [1], [0, 0, 1, 1], [], []>} : vector<8x32xbf16>, vector<32x32xbf16>, vector<8x32xf32> -> vector<8x32xf32>
    %100 = vector.broadcast %9 : vector<1x32xf32> to vector<8x32xf32>
    %101 = arith.addf %99, %100 : vector<8x32xf32>
    %102 = arith.addf %101, %89 : vector<8x32xf32>
    %c0_34 = arith.constant 0 : index
    %c0_35 = arith.constant 0 : index
    %103 = vector.load %arg3[%c0_34, %c0_35] : memref<8x1xf32, #tpu.memory_space<vmem>>, vector<8x1xf32>
    %104 = vector.broadcast %103 : vector<8x1xf32> to vector<8x32xf32>
    %105 = arith.mulf %102, %104 : vector<8x32xf32>
    %cst_36 = arith.constant dense<0.000000e+00> : vector<8xf32>
    %106 = vector.multi_reduction <add>, %105, %cst_36 [1] : vector<8x32xf32> to vector<8xf32>
    %107 = vector.shape_cast %106 : vector<8xf32> to vector<8x1xf32>
    %cst_37 = arith.constant 3.200000e+01 : f32
    %108 = vector.broadcast %cst_37 : f32 to vector<8x1xf32>
    %109 = arith.divf %107, %108 : vector<8x1xf32>
    %110 = vector.broadcast %109 : vector<8x1xf32> to vector<8x32xf32>
    %111 = arith.subf %105, %110 : vector<8x32xf32>
    %112 = arith.mulf %111, %111 : vector<8x32xf32>
    %cst_38 = arith.constant dense<0.000000e+00> : vector<8xf32>
    %113 = vector.multi_reduction <add>, %112, %cst_38 [1] : vector<8x32xf32> to vector<8xf32>
    %114 = vector.shape_cast %113 : vector<8xf32> to vector<8x1xf32>
    %cst_39 = arith.constant 3.200000e+01 : f32
    %115 = vector.broadcast %cst_39 : f32 to vector<8x1xf32>
    %116 = arith.divf %114, %115 : vector<8x1xf32>
    %117 = vector.broadcast %109 : vector<8x1xf32> to vector<8x32xf32>
    %118 = arith.subf %105, %117 : vector<8x32xf32>
    %cst_40 = arith.constant 9.99999974E-6 : f32
    %119 = vector.broadcast %cst_40 : f32 to vector<8x1xf32>
    %120 = arith.addf %116, %119 : vector<8x1xf32>
    %121 = math.rsqrt %120 : vector<8x1xf32>
    %122 = vector.broadcast %121 : vector<8x1xf32> to vector<8x32xf32>
    %123 = arith.mulf %118, %122 : vector<8x32xf32>
    %124 = vector.broadcast %5 : vector<1x32xf32> to vector<8x32xf32>
    %125 = arith.mulf %123, %124 : vector<8x32xf32>
    %126 = vector.broadcast %6 : vector<1x32xf32> to vector<8x32xf32>
    %127 = arith.addf %125, %126 : vector<8x32xf32>
    %c0_41 = arith.constant 0 : index
    %c0_42 = arith.constant 0 : index
    %c0_43 = arith.constant 0 : index
    %128 = vector.load %arg4[%c0_41, %c0_42, %c0_43] : memref<8x128x32xbf16, #tpu.memory_space<vmem>>, vector<8x128x32xbf16>
    %129 = arith.extf %128 : vector<8x128x32xbf16> to vector<8x128x32xf32>
    %130 = vector.shape_cast %127 : vector<8x32xf32> to vector<8x1x32xf32>
    %131 = vector.broadcast %130 : vector<8x1x32xf32> to vector<8x128x32xf32>
    %132 = arith.mulf %131, %129 : vector<8x128x32xf32>
    %cst_44 = arith.constant dense<0.000000e+00> : vector<8x128xf32>
    %133 = vector.multi_reduction <add>, %132, %cst_44 [2] : vector<8x128x32xf32> to vector<8x128xf32>
    %c0_45 = arith.constant 0 : index
    %c0_46 = arith.constant 0 : index
    %134 = vector.load %arg11[%c0_45, %c0_46] : memref<8x128xf32, #tpu.memory_space<vmem>>, vector<8x128xf32>
    tpu.vector_store %arg11[%c0_45, %c0_46], %133 {strides = array<i32>} : memref<8x128xf32, #tpu.memory_space<vmem>>, vector<8x128xf32>,
    return
  }
  func.func @transform_0(%arg0: i32) -> (i32, i32) {
    %c0_i32 = arith.constant 0 : i32
    %c0_i32_0 = arith.constant 0 : i32
    return %arg0, %c0_i32 : i32, i32
  }
  func.func @transform_1(%arg0: i32) -> (i32, i32) {
    %c0_i32 = arith.constant 0 : i32
    %c0_i32_0 = arith.constant 0 : i32
    return %arg0, %c0_i32 : i32, i32
  }
  func.func @transform_2(%arg0: i32) -> (i32, i32) {
    %c0_i32 = arith.constant 0 : i32
    %c0_i32_0 = arith.constant 0 : i32
    return %arg0, %c0_i32 : i32, i32
  }
  func.func @transform_3(%arg0: i32) -> (i32, i32, i32) {
    %c0_i32 = arith.constant 0 : i32
    %c0_i32_0 = arith.constant 0 : i32
    %c0_i32_1 = arith.constant 0 : i32
    return %arg0, %c0_i32, %c0_i32_0 : i32, i32, i32
  }
  func.func @transform_4(%arg0: i32) -> (i32, i32) {
    %c0_i32 = arith.constant 0 : i32
    %c0_i32_0 = arith.constant 0 : i32
    %c0_i32_1 = arith.constant 0 : i32
    return %c0_i32, %c0_i32_0 : i32, i32
  }
  func.func @transform_5(%arg0: i32) -> (i32, i32) {
    %c0_i32 = arith.constant 0 : i32
    %c0_i32_0 = arith.constant 0 : i32
    %c0_i32_1 = arith.constant 0 : i32
    return %c0_i32, %c0_i32_0 : i32, i32
  }
  func.func @transform_6(%arg0: i32) -> (i32, i32) {
    %c0_i32 = arith.constant 0 : i32
    %c0_i32_0 = arith.constant 0 : i32
    %c0_i32_1 = arith.constant 0 : i32
    return %c0_i32, %c0_i32_0 : i32, i32
  }
  func.func @transform_7(%arg0: i32) -> (i32, i32) {
    %c0_i32 = arith.constant 0 : i32
    %c0_i32_0 = arith.constant 0 : i32
    %c0_i32_1 = arith.constant 0 : i32
    return %c0_i32, %c0_i32_0 : i32, i32
  }
  func.func @transform_8(%arg0: i32) -> (i32, i32) {
    %c0_i32 = arith.constant 0 : i32
    %c0_i32_0 = arith.constant 0 : i32
    %c0_i32_1 = arith.constant 0 : i32
    return %c0_i32, %c0_i32_0 : i32, i32
  }
  func.func @transform_9(%arg0: i32) -> (i32, i32) {
    %c0_i32 = arith.constant 0 : i32
    %c0_i32_0 = arith.constant 0 : i32
    %c0_i32_1 = arith.constant 0 : i32
    return %c0_i32, %c0_i32_0 : i32, i32
  }
  func.func @transform_10(%arg0: i32) -> (i32, i32) {
    %c0_i32 = arith.constant 0 : i32
    %c0_i32_0 = arith.constant 0 : i32
    return %arg0, %c0_i32 : i32, i32
  }
}

</mosaic_0001>

<bundles_post_ra>
// kernel: tpu_custom_call.1
= control target key start
LH: loop header
LB: loop body
LE: loop exit
PB: predicated region body
PF: predicated region fallthrough
CT: control target
= control target key end

     0   :  { %vm87_vm0 = vcmask 261120   ;;  %s4020_s0 = inlined_call_operand.vmem [shape: bf16[64,32], index: 0, kind: input, shape index: {}]   ;;  %s4021_s1 = inlined_call_operand.vmem [shape: f32[8,32], index: 1, kind: input, shape index: {}]   ;;  %s4022_s2 = inlined_call_operand.vmem [shape: f32[8,1], index: 2, kind: input, shape index: {}]   ;;  %s4023_s3 = inlined_call_operand.vmem [shape: bf16[8,128,32], index: 3, kind: input, shape index: {}]   ;;  %s4024_s4 = inlined_call_operand.vmem [shape: bf16[32,32], index: 4, kind: input, shape index: {}]   ;;  %s4025_s5 = inlined_call_operand.vmem [shape: bf16[32,64], index: 5, kind: input, shape index: {}]   ;;  %s4026_s6 = inlined_call_operand.vmem [shape: bf16[32,32], index: 6, kind: input, shape index: {}]   ;;  %s4027_s7 = inlined_call_operand.vmem [shape: bf16[32,32], index: 7, kind: input, shape index: {}]   ;;  %s4028_s8 = inlined_call_operand.vmem [shape: f32[9,32], index: 8, kind: input, shape index: {}]   ;;  %s4029_s9 = inlined_call_operand.vmem [shape: f32[1,64], index: 9, kind: input, shape index: {}]   ;;  %s4030_s10 = inlined_call_operand.hbm [shape: f32[8,128], index: 10, kind: output, shape index: {}]  }
   0x1   :  { %v129_v0 = vld [vmem:[%s4021_s1] sm:$0xff] }
   0x2   :  { %v130_v1 = vsel %vm87_vm0, %v129_v0, 0.0 }
   0x3   :  { %15 = vsyncpa [#allocation3], 0  ;;  %131 = vadd.xlane.f32.xlu0 %v130_v1  ;;  %v2557_v2 = vmov 32.0   ;;  %v2163_v14 = vld [vmem:[%s4025_s5 + $0x8] sm:$0xff]  ;;  %v2162_v15 = vld [vmem:[%s4025_s5] sm:$0xff]  ;;  %vm279_vm5 = vcmask 1041409  }
   0x4   :  { %2503 = vrcp.f32 %v2557_v2  ;;  %2489 = vmatpush.bf16.msra.mxu1 %v2163_v14  ;;  %106 = vmatpush.bf16.msra.mxu0 %v2163_v14  ;;  %v2160_v16 = vld [vmem:[%s4020_s0 + $0x10] sm:$0xff]  ;;  %v2158_v17 = vld [vmem:[%s4020_s0] sm:$0xff]  ;;  %v2161_v18 = vld [vmem:[%s4020_s0 + $0x18] sm:$0xff]  ;;  %vm4036_vm6 = vcmask 1042434   ;;  %vm4035_vm7 = vcmask 1043459   ;;  %vm4034_vm8 = vcmask 1044484  }
   0x5   :  { %2490 = vmatpush.bf16.msra.mxu2 %v2163_v14  ;;  %v2165_v19 = vld [vmem:[%s4024_s4 + $0x8] sm:$0xff]  ;;  %v2164_v21 = vld [vmem:[%s4024_s4] sm:$0xff]  ;;  %vm4033_vm9 = vcmask 1045509   ;;  %vm4032_vm10 = vcmask 1046534   ;;  %vm4031_vm11 = vcmask 1047559   ;;  %vm294_vm12 = vcmask 64512  }
   0x6   :  { %v2159_v20 = vld [vmem:[%s4020_s0 + $0x8] sm:$0xff]  ;;  %v2657_v29 = vld [vmem:[%s4028_s8] sm:$0xff]  ;;  %vm464_vm13 = vcmask 523520   ;;  %s2560_s11 = smov 96  }
   0x7   :  { %v159_v32 = vperm.slane %v2657_v29, 0  ;;  %v161_v35 = vperm.slane %v2657_v29, 1  ;;  %v168_v45 = vperm.slane %v2657_v29, 6  ;;  %v2501_v46 = vld [vmem:[%s4029_s9] ss:$0 sm:$0xff]  ;;  %s2559_s9 = smov 32  }
   0x8   :  { %2491 = vmatpush.bf16.msra.mxu1 %v2162_v15  ;;  %107 = vmatpush.bf16.msra.mxu0 %v2162_v15 }
   0x9   :  { %2492 = vmatpush.bf16.msra.mxu2 %v2162_v15 }
   0xa   :  { %v2504_v3 = vpop.eup %2503 }
   0xb   :  { %v134_v4 = vmul.f32 32.0, %v2504_v3  ;;  %vm138_vm1 = vweird.f32 %v2504_v3  ;;  %2129 = vmatmul.msk.bf16.vlgmr.msra.gmra.mxu1 %vm87_vm0, %v2160_v16  ;;  %2127 = vmatmul.msk.bf16.vlgmr.msra.gmra.mxu0 %vm87_vm0, %v2158_v17 }
   0xc   :  { %2130 = vmatmul.msk.bf16.vlgmr.msra.gmra.mxu2 %vm87_vm0, %v2161_v18  ;;  %190 = vmatpush.bf16.msrb.mxu1 %v2165_v19 }
   0xd   :  { %v135_v5 = vsub.f32 1.0, %v134_v4 }
   0xf   :  { %v136_v6 = vmul.f32 %v2504_v3, %v135_v5 }
  0x10   :  { %191 = vmatpush.bf16.msrb.mxu1 %v2164_v21 }
  0x11   :  { %v137_v7 = vadd.f32 %v2504_v3, %v136_v6 }
  0x13   :  { %v2621_v8 = vsel %vm138_vm1, %v2504_v3, %v137_v7 }
  0x1b   :  { %2128 = vmatmul.msk.bf16.gmra.mxu0 %vm87_vm0, %v2159_v20 }
  0x76   :  { %v132_v9 = vpop.xlane.xlu0 %131 }
  0x77   :  { %v140_v10 = vmul.f32 %v2621_v8, %v132_v9 }
  0x79   :  { %v141_v11 = vsub.f32 %v129_v0, %v140_v10 }
  0x7b   :  { %v142_v12 = vmul.f32 %v141_v11, %v141_v11 }
  0x7d   :  { %v143_v13 = vsel %vm87_vm0, %v142_v12, 0.0 }
  0x7e   :  { %144 = vadd.xlane.f32.xlu0 %v143_v13 }
  0x88   :  { %v109_v39 = vpop.f32.mrf.mxu0  ;;  %v119_v40 = vpop.f32.mrf.mxu1 }
  0x89   :  { %v2670_v49 = vadd.f32 %v2501_v46, %v109_v39  ;;  %v2674_v55 = vadd.f32 %v2501_v46, %v119_v40 }
  0x8f   :  { %v124_v44 = vpop.f32.mrf.mxu2 }
  0x90   :  { %v111_v41 = vpop.f32.mrf.mxu0  ;;  %v121_v42 = vpop.f32.mrf.mxu1  ;;  %v2694_v20 = vadd.f32 %v2501_v46, %v124_v44 }
  0x91   :  { %v2680_v3 = vadd.f32 %v2501_v46, %v111_v41  ;;  %v2692_v19 = vadd.f32 %v2501_v46, %v121_v42 }
  0x97   :  { %v126_v58 = vpop.f32.mrf.mxu2 }
  0x98   :  { %v114_v43 = vpop.f32.mrf.mxu0  ;;  %v2684_v5 = vadd.f32 %v2501_v46, %v126_v58 }
  0x99   :  { %v2672_v50 = vadd.f32 %v2501_v46, %v114_v43 }
  0xa0   :  { %v116_v57 = vpop.f32.mrf.mxu0 }
  0xa1   :  { %v2682_v4 = vadd.f32 %v2501_v46, %v116_v57 }
  0xf1   :  { %v145_v22 = vpop.xlane.xlu0 %144 }
  0xf2   :  { %v146_v23 = vmul.f32 %v145_v22, %v2621_v8 }
  0xf4   :  { %v147_v24 = vadd.f32 1e-05, %v146_v23 }
  0xf6   :  { %2505 = vrsqrt.f32 %v147_v24  ;;  %vm154_vm3 = vweird.f32 %v147_v24 }
  0xfc   :  { %v2506_v25 = vpop.eup %2505 }
  0xfd   :  { %v149_v26 = vmul.f32 %v2506_v25, %v147_v24  ;;  %vm155_vm2 = vweird.f32 %v2506_v25 }
  0xfe   :  { %vm156_vm4 = vmor %vm154_vm3, %vm155_vm2 }
  0xff   :  { %v150_v27 = vmul.f32 %v2506_v25, %v149_v26 }
 0x101   :  { %v151_v28 = vmul.f32 0.5, %v150_v27 }
 0x103   :  { %v152_v30 = vsub.f32 1.5, %v151_v28 }
 0x105   :  { %v153_v31 = vmul.f32 %v2506_v25, %v152_v30 }
 0x107   :  { %v157_v33 = vsel %vm156_vm4, %v2506_v25, %v153_v31  ;;  %v269_v31 = vlaneseq }
 0x108   :  { %v158_v34 = vmul.f32 %v157_v33, %v141_v11 }
 0x109   :  { %v2702_v33 = vand.u32 127, %v269_v31 }
 0x10a   :  { %v160_v36 = vmul.f32 %v159_v32, %v158_v34 }
 0x10c   :  { %v2661_v37 = vadd.f32 %v161_v35, %v160_v36 }
 0x10e   :  { %v163_v38 = vpack.c.bf16 %v2661_v37, %v2661_v37 }
 0x110   :  { %2139 = vmatmul.msk.bf16.vlgmr.msrb.gmra.mxu1 %vm87_vm0, %v163_v38 }
 0x18d   :  { %v193_v47 = vpop.f32.mrf.mxu1 }
 0x18e   :  { %v194_v48 = vadd.f32 %v193_v47, %v168_v45 }
 0x190   :  { %v205_v51 = vperm.slane %v194_v48, 0  ;;  %v201_v52 = vrot.slane %v194_v48, 4  ;;  %v199_v53 = vrot.slane %v194_v48, 2  ;;  %v198_v54 = vrot.slane %v194_v48, 1 }
 0x191   :  { %v204_v56 = vrot.slane %v194_v48, 7  ;;  %v200_v62 = vrot.slane %v194_v48, 3  ;;  %v202_v13 = vrot.slane %v194_v48, 5  ;;  %v203_v16 = vrot.slane %v194_v48, 6 }
 0x192   :  { %v221_v59 = vmul.f32 %v205_v51, %v2670_v49  ;;  %v209_v60 = vperm.slane %v201_v52, 0  ;;  %v207_v61 = vperm.slane %v199_v53, 0  ;;  %v206_v2 = vperm.slane %v198_v54, 0 }
 0x193   :  { %v212_v10 = vperm.slane %v204_v56, 0  ;;  %v208_v11 = vperm.slane %v200_v62, 0  ;;  %v210_v18 = vperm.slane %v202_v13, 0  ;;  %v211_v23 = vperm.slane %v203_v16, 0 }
 0x194   :  { %v229_v63 = vsel %vm87_vm0, %v221_v59, 0.0  ;;  %v225_v0 = vmul.f32 %v209_v60, %v2674_v55  ;;  %v223_v1 = vmul.f32 %v207_v61, %v2672_v50  ;;  %v222_v12 = vmul.f32 %v206_v2, %v2680_v3 }
 0x195   :  { %v195_v6 = vpop.f32.mrf.mxu1  ;;  %230 = vadd.xlane.f32.xlu1 %v229_v63  ;;  %v228_v14 = vmul.f32 %v212_v10, %v2684_v5  ;;  %v224_v15 = vmul.f32 %v208_v11, %v2682_v4  ;;  %v226_v24 = vmul.f32 %v210_v18, %v2692_v19  ;;  %v227_v25 = vmul.f32 %v211_v23, %v2694_v20 }
 0x196   :  { %v241_v7 = vsel %vm87_vm0, %v225_v0, 0.0  ;;  %v235_v9 = vsel %vm87_vm0, %v223_v1, 0.0  ;;  %v232_v17 = vsel %vm87_vm0, %v222_v12, 0.0  ;;  %v2558_v6 = vmov 0  }
 0x197   :  { %242 = vadd.xlane.f32.xlu0 %v241_v7  ;;  %236 = vadd.xlane.f32.xlu2 %v235_v9  ;;  %v250_v21 = vsel %vm87_vm0, %v228_v14, 0.0  ;;  %v238_v22 = vsel %vm87_vm0, %v224_v15, 0.0  ;;  %v244_v26 = vsel %vm87_vm0, %v226_v24, 0.0  ;;  %v247_v27 = vsel %vm87_vm0, %v227_v25, 0.0 }
 0x198   :  { %2500 = vset.pattern.permute.xlu1 %v2558_v6  ;;  %2499 = vset.pattern.permute.xlu0 %v2558_v6 }
 0x199   :  { %2498 = vset.pattern.permute.xlu2 %v2558_v6 }
 0x19d   :  { %233 = vadd.xlane.f32.xlu1 %v232_v17 }
 0x19f   :  { %251 = vadd.xlane.f32.xlu0 %v250_v21  ;;  %239 = vadd.xlane.f32.xlu2 %v238_v22 }
 0x1a5   :  { %245 = vadd.xlane.f32.xlu1 %v244_v26 }
 0x1a7   :  { %248 = vadd.xlane.f32.xlu2 %v247_v27 }
 0x208   :  { %v231_v28 = vpop.xlane.xlu1 %230 }
 0x209   :  { %v253_v34 = vmul.f32 0.17677669, %v231_v28 }
 0x20a   :  { %v237_v30 = vpop.xlane.xlu2 %236  ;;  %v243_v32 = vpop.xlane.xlu0 %242 }
 0x20b   :  { %v255_v35 = vmul.f32 0.17677669, %v237_v30  ;;  %v271_v40 = vperm.slane %v253_v34, %v2702_v33  ;;  %v257_v46 = vmul.f32 0.17677669, %v243_v32 }
 0x20d   :  { %v273_v43 = vperm.slane %v255_v35, %v2702_v33  ;;  %v275_v54 = vperm.slane %v257_v46, %v2702_v33 }
 0x210   :  { %v234_v36 = vpop.xlane.xlu1 %233 }
 0x211   :  { %v254_v38 = vmul.f32 0.17677669, %v234_v36 }
 0x212   :  { %v240_v39 = vpop.xlane.xlu2 %239  ;;  %v252_v48 = vpop.xlane.xlu0 %251 }
 0x213   :  { %v272_v41 = vperm.slane %v254_v38, %v2702_v33  ;;  %v256_v42 = vmul.f32 0.17677669, %v240_v39  ;;  %v260_v56 = vmul.f32 0.17677669, %v252_v48 }
 0x215   :  { %v280_v44 = vsel %vm279_vm5, %v272_v41, %v271_v40  ;;  %v274_v45 = vperm.slane %v256_v42, %v2702_v33  ;;  %v278_v63 = vperm.slane %v260_v56, %v2702_v33 }
 0x216   :  { %v282_v47 = vsel %vm4036_vm6, %v273_v43, %v280_v44 }
 0x217   :  { %v284_v52 = vsel %vm4035_vm7, %v274_v45, %v282_v47  ;;  %v523_v45 = vrot.slane %v2661_v37, 2  ;;  %v522_v47 = vrot.slane %v2661_v37, 1 }
 0x218   :  { %v246_v51 = vpop.xlane.xlu1 %245  ;;  %v286_v60 = vsel %vm4034_vm8, %v275_v54, %v284_v52 }
 0x219   :  { %v258_v53 = vmul.f32 0.17677669, %v246_v51 }
 0x21a   :  { %v249_v57 = vpop.xlane.xlu2 %248 }
 0x21b   :  { %v276_v58 = vperm.slane %v258_v53, %v2702_v33  ;;  %v259_v59 = vmul.f32 0.17677669, %v249_v57 }
 0x21d   :  { %v277_v61 = vperm.slane %v259_v59, %v2702_v33  ;;  %v288_v62 = vsel %vm4033_vm9, %v276_v58, %v286_v60 }
 0x21f   :  { %v290_v0 = vsel %vm4032_vm10, %v277_v61, %v288_v62 }
 0x220   :  { %v292_v1 = vsel %vm4031_vm11, %v278_v63, %v290_v0 }
 0x221   :  { %v295_v2 = vsel %vm294_vm12, %v292_v1, -inf }
 0x222   :  { %296 = vmax.xlane.f32.xlu1 %v295_v2 }
 0x295   :  { %v297_v7 = vpop.xlane.xlu1 %296 }
 0x296   :  { %v301_v9 = vperm.slane %v297_v7, 2  ;;  %v300_v10 = vperm.slane %v297_v7, 1  ;;  %v299_v11 = vperm.slane %v297_v7, 0  ;;  %v304_v15 = vperm.slane %v297_v7, 5 }
 0x297   :  { %v302_v16 = vperm.slane %v297_v7, 3  ;;  %v306_v25 = vperm.slane %v297_v7, 7  ;;  %v303_v28 = vperm.slane %v297_v7, 4  ;;  %v305_v39 = vperm.slane %v297_v7, 6 }
 0x298   :  { %v317_v12 = vsub.f32 %v255_v35, %v301_v9  ;;  %v316_v13 = vsub.f32 %v254_v38, %v300_v10  ;;  %v315_v14 = vsub.f32 %v253_v34, %v299_v11  ;;  %v320_v22 = vsub.f32 %v258_v53, %v304_v15 }
 0x299   :  { %v318_v23 = vsub.f32 %v256_v42, %v302_v16  ;;  %v322_v32 = vsub.f32 %v260_v56, %v306_v25  ;;  %v319_v34 = vsub.f32 %v257_v46, %v303_v28  ;;  %v321_v41 = vsub.f32 %v259_v59, %v305_v39 }
 0x29a   :  { %v327_v17 = vmul.f32 1.442695, %v317_v12  ;;  %v325_v18 = vmul.f32 1.442695, %v316_v13  ;;  %v323_v21 = vmul.f32 1.442695, %v315_v14 }
 0x29b   :  { %v333_v24 = vmul.f32 1.442695, %v320_v22  ;;  %v329_v27 = vmul.f32 1.442695, %v318_v23  ;;  %v337_v35 = vmul.f32 1.442695, %v322_v32 }
 0x29c   :  { %2507 = vpow2.f32 %v327_v17  ;;  %v331_v38 = vmul.f32 1.442695, %v319_v34  ;;  %v335_v43 = vmul.f32 1.442695, %v321_v41  ;;  %v525_v15 = vrot.slane %v2661_v37, 4 }
 0x29d   :  { %2509 = vpow2.f32 %v325_v18 }
 0x29e   :  { %2511 = vpow2.f32 %v323_v21 }
 0x29f   :  { %2513 = vpow2.f32 %v333_v24 }
 0x2a0   :  { %2515 = vpow2.f32 %v329_v27 }
 0x2a1   :  { %2517 = vpow2.f32 %v337_v35 }
 0x2a2   :  { %v2720_v26 = vpop.eup %2507  ;;  %2519 = vpow2.f32 %v331_v38 }
 0x2a3   :  { %v2722_v30 = vpop.eup %2509  ;;  %354 = vperm.xlu1 %2500, %v2720_v26   ;;  %2521 = vpow2.f32 %v335_v43  ;;  %v528_v43 = vrot.slane %v2661_v37, 7 }
 0x2a4   :  { %v2725_v31 = vpop.eup %2511  ;;  %351 = vperm.xlu0 %2499, %v2722_v30  }
 0x2a5   :  { %348 = vperm.xlu2 %2498, %v2725_v31   ;;  %v2729_v36 = vpop.eup %2513 }
 0x2a6   :  { %v2516_v40 = vpop.eup %2515 }
 0x2a7   :  { %v2732_v42 = vpop.eup %2517 }
 0x2a8   :  { %v2520_v44 = vpop.eup %2519 }
 0x2a9   :  { %v2522_v46 = vpop.eup %2521 }
 0x2ab   :  { %363 = vperm.xlu1 %2500, %v2729_v36  }
 0x2ad   :  { %357 = vperm.xlu2 %2498, %v2516_v40  }
 0x2b3   :  { %369 = vperm.xlu1 %2500, %v2732_v42  }
 0x2b5   :  { %360 = vperm.xlu2 %2498, %v2520_v44  }
 0x2bb   :  { %533 = vrot.lane.b32.xlu1 %v523_v45, %s2559_s9 }
 0x2bd   :  { %366 = vperm.xlu2 %2498, %v2522_v46  }
 0x2c5   :  { %531 = vrot.lane.b32.xlu2 %v522_v47, %s2559_s9 }
 0x2cd   :  { %529 = vrot.lane.b32.xlu2 %v2661_v37, %s2559_s9 }
 0x2ff   :  { %v349_v48 = vpop.permute.xlu2 %348 }
 0x300   :  { %v371_v56 = vperm.slane %v349_v48, %v2702_v33 }
 0x307   :  { %v358_v51 = vpop.permute.xlu2 %357 }
 0x308   :  { %v374_v62 = vperm.slane %v358_v51, %v2702_v33 }
 0x30f   :  { %v361_v57 = vpop.permute.xlu2 %360 }
 0x310   :  { %v375_v1 = vperm.slane %v361_v57, %v2702_v33 }
 0x315   :  { %v355_v52 = vpop.permute.xlu1 %354 }
 0x316   :  { %v352_v53 = vpop.permute.xlu0 %351  ;;  %v373_v58 = vperm.slane %v355_v52, %v2702_v33 }
 0x317   :  { %v372_v54 = vperm.slane %v352_v53, %v2702_v33  ;;  %v367_v2 = vpop.permute.xlu2 %366 }
 0x318   :  { %v377_v9 = vperm.slane %v367_v2, %v2702_v33 }
 0x319   :  { %v379_v59 = vsel %vm279_vm5, %v372_v54, %v371_v56 }
 0x31a   :  { %v380_v60 = vsel %vm4036_vm6, %v373_v58, %v379_v59 }
 0x31b   :  { %v381_v63 = vsel %vm4035_vm7, %v374_v62, %v380_v60 }
 0x31c   :  { %v382_v6 = vsel %vm4034_vm8, %v375_v1, %v381_v63 }
 0x31d   :  { %v364_v61 = vpop.permute.xlu1 %363 }
 0x31e   :  { %v376_v0 = vperm.slane %v364_v61, %v2702_v33 }
 0x320   :  { %v383_v7 = vsel %vm4033_vm9, %v376_v0, %v382_v6 }
 0x321   :  { %v384_v12 = vsel %vm4032_vm10, %v377_v9, %v383_v7 }
 0x325   :  { %v370_v10 = vpop.permute.xlu1 %369 }
 0x326   :  { %v378_v11 = vperm.slane %v370_v10, %v2702_v33 }
 0x328   :  { %v385_v13 = vsel %vm4031_vm11, %v378_v11, %v384_v12 }
 0x329   :  { %v387_v14 = vsel %vm294_vm12, %v385_v13, 0.0  ;;  %vm1803_vm12 = vcmask 130112  }
 0x32a   :  { %388 = vadd.xlane.f32.xlu0 %v387_v14 }
 0x32d   :  { %v534_v47 = vpop.permute.xlu1 %533 }
 0x33e   :  { %537 = vrot.lane.b32.xlu0 %v525_v15, %s2559_s9 }
 0x39d   :  { %v389_v16 = vpop.xlane.xlu0 %388 }
 0x39e   :  { %2523 = vrcp.f32 %v389_v16 }
 0x3a4   :  { %v2524_v17 = vpop.eup %2523 }
 0x3a5   :  { %v394_v18 = vperm.slane %v2524_v17, 2  ;;  %v393_v21 = vperm.slane %v2524_v17, 1  ;;  %v395_v24 = vperm.slane %v2524_v17, 3  ;;  %v392_v25 = vperm.slane %v2524_v17, 0 }
 0x3a6   :  { %v397_v32 = vperm.slane %v2524_v17, 5  ;;  %v396_v34 = vperm.slane %v2524_v17, 4  ;;  %v399_v39 = vperm.slane %v2524_v17, 7 }
 0x3a7   :  { %v410_v22 = vmul.f32 %v2720_v26, %v394_v18  ;;  %v409_v23 = vmul.f32 %v2722_v30, %v393_v21  ;;  %v411_v27 = vmul.f32 %v2516_v40, %v395_v24  ;;  %v408_v28 = vmul.f32 %v2725_v31, %v392_v25 }
 0x3a8   :  { %v413_v35 = vmul.f32 %v2729_v36, %v397_v32  ;;  %v412_v38 = vmul.f32 %v2520_v44, %v396_v34  ;;  %v398_v26 = vperm.slane %v2524_v17, 6  ;;  %v415_v30 = vmul.f32 %v2732_v42, %v399_v39  ;;  %v2772_v42 = vpop.permute.xlu2 %531 }
 0x3a9   :  { %428 = vperm.xlu1 %2500, %v410_v22   ;;  %423 = vperm.xlu2 %2498, %v409_v23   ;;  %v524_v40 = vrot.slane %v2661_v37, 3  ;;  %v526_v31 = vrot.slane %v2661_v37, 5  ;;  %v527_v36 = vrot.slane %v2661_v37, 6 }
 0x3aa   :  { %v414_v41 = vmul.f32 %v2522_v46, %v398_v26 }
 0x3b0   :  { %v2774_v44 = vpop.permute.xlu2 %529 }
 0x3b1   :  { %433 = vperm.xlu1 %2500, %v411_v27   ;;  %418 = vperm.xlu2 %2498, %v408_v28  }
 0x3b9   :  { %443 = vperm.xlu1 %2500, %v413_v35   ;;  %438 = vperm.xlu2 %2498, %v412_v38  }
 0x3c1   :  { %453 = vperm.xlu1 %2500, %v415_v30   ;;  %448 = vperm.xlu2 %2498, %v414_v41  }
 0x3c9   :  { %535 = vrot.lane.b32.xlu1 %v524_v40, %s2559_s9  ;;  %539 = vrot.lane.b32.xlu2 %v526_v31, %s2559_s9 }
 0x3d1   :  { %541 = vrot.lane.b32.xlu1 %v527_v36, %s2559_s9  ;;  %543 = vrot.lane.b32.xlu2 %v528_v43, %s2559_s9 }
 0x403   :  { %v424_v45 = vpop.permute.xlu2 %423 }
 0x404   :  { %v457_v48 = vmul.f32 %v424_v45, %v2680_v3 }
 0x406   :  { %v472_v54 = vsel %vm464_vm13, %v457_v48, 0.0 }
 0x407   :  { %v473_v60 = vrot.slane %v472_v54, 4 }
 0x409   :  { %v474_v1 = vadd.f32 %v473_v60, %v472_v54 }
 0x40b   :  { %v419_v46 = vpop.permute.xlu2 %418  ;;  %v475_v10 = vrot.slane %v474_v1, 2 }
 0x40c   :  { %v456_v53 = vmul.f32 %v419_v46, %v2670_v49 }
 0x40e   :  { %v465_v58 = vsel %vm464_vm13, %v456_v53, 0.0 }
 0x40f   :  { %v466_v61 = vrot.slane %v465_v58, 4 }
 0x411   :  { %v467_v6 = vadd.f32 %v466_v61, %v465_v58 }
 0x413   :  { %v439_v51 = vpop.permute.xlu2 %438  ;;  %v468_v13 = vrot.slane %v467_v6, 2 }
 0x414   :  { %v460_v57 = vmul.f32 %v439_v51, %v2674_v55 }
 0x415   :  { %v469_v24 = vadd.f32 %v468_v13, %v467_v6 }
 0x416   :  { %v493_v3 = vsel %vm464_vm13, %v460_v57, 0.0 }
 0x417   :  { %v470_v38 = vrot.slane %v469_v24, 1 }
 0x419   :  { %v471_v46 = vadd.f32 %v470_v38, %v469_v24 }
 0x41b   :  { %v429_v52 = vpop.permute.xlu1 %428  ;;  %v449_v0 = vpop.permute.xlu2 %448 }
 0x41c   :  { %v458_v37 = vmul.f32 %v429_v52, %v2672_v50  ;;  %v494_v50 = vrot.slane %v493_v3, 4  ;;  %v462_v7 = vmul.f32 %v449_v0, %v2694_v20 }
 0x41e   :  { %v479_v56 = vsel %vm464_vm13, %v458_v37, 0.0  ;;  %v495_v11 = vadd.f32 %v494_v50, %v493_v3  ;;  %v507_v14 = vsel %vm464_vm13, %v462_v7, 0.0 }
 0x41f   :  { %v480_v59 = vrot.slane %v479_v56, 4  ;;  %v508_v21 = vrot.slane %v507_v14, 4 }
 0x420   :  { %v496_v18 = vrot.slane %v495_v11, 2 }
 0x421   :  { %v481_v63 = vadd.f32 %v480_v59, %v479_v56  ;;  %v509_v34 = vadd.f32 %v508_v21, %v507_v14 }
 0x422   :  { %v497_v32 = vadd.f32 %v496_v18, %v495_v11 }
 0x423   :  { %v434_v62 = vpop.permute.xlu1 %433  ;;  %v482_v9 = vrot.slane %v481_v63, 2  ;;  %v510_v36 = vrot.slane %v509_v34, 2  ;;  %v540_v52 = vpop.permute.xlu2 %539 }
 0x424   :  { %v459_v49 = vmul.f32 %v434_v62, %v2682_v4  ;;  %v476_v4 = vadd.f32 %v475_v10, %v474_v1  ;;  %v498_v31 = vrot.slane %v497_v32, 1  ;;  %v538_v62 = vpop.permute.xlu0 %537 }
 0x425   :  { %v483_v16 = vadd.f32 %v482_v9, %v481_v63  ;;  %v511_v58 = vadd.f32 %v510_v36, %v509_v34 }
 0x426   :  { %v486_v2 = vsel %vm464_vm13, %v459_v49, 0.0  ;;  %v477_v27 = vrot.slane %v476_v4, 1  ;;  %v499_v56 = vadd.f32 %v498_v31, %v497_v32 }
 0x427   :  { %v487_v55 = vrot.slane %v486_v2, 4  ;;  %v484_v25 = vrot.slane %v483_v16, 1  ;;  %v512_v50 = vrot.slane %v511_v58, 1 }
 0x428   :  { %v478_v41 = vadd.f32 %v477_v27, %v476_v4  ;;  %v557_v1 = vadd.f32 %v538_v62, %v499_v56 }
 0x429   :  { %v488_v12 = vadd.f32 %v487_v55, %v486_v2  ;;  %v485_v30 = vadd.f32 %v484_v25, %v483_v16  ;;  %v513_v11 = vadd.f32 %v512_v50, %v511_v58 }
 0x42a   :  { %v554_v53 = vadd.f32 %v2772_v42, %v478_v41  ;;  %v575_v9 = vrot.slane %v557_v1, 4 }
 0x42b   :  { %v444_v15 = vpop.permute.xlu1 %443  ;;  %v489_v22 = vrot.slane %v488_v12, 2  ;;  %v555_v51 = vadd.f32 %v534_v47, %v485_v30  ;;  %v544_v10 = vpop.permute.xlu2 %543 }
 0x42c   :  { %v461_v17 = vmul.f32 %v444_v15, %v2692_v19  ;;  %v569_v63 = vrot.slane %v554_v53, 7 }
 0x42d   :  { %v490_v35 = vadd.f32 %v489_v22, %v488_v12  ;;  %v571_v61 = vrot.slane %v555_v51, 6 }
 0x42e   :  { %v500_v23 = vsel %vm464_vm13, %v461_v17, 0.0 }
 0x42f   :  { %v501_v20 = vrot.slane %v500_v23, 4  ;;  %v491_v45 = vrot.slane %v490_v35, 1 }
 0x431   :  { %v502_v28 = vadd.f32 %v501_v20, %v500_v23  ;;  %v492_v57 = vadd.f32 %v491_v45, %v490_v35  ;;  %v847_v20 = vld [vmem:[%s4022_s2] sm:$0xff]  ;;  %s2094_s2 = sshll.u32 %s4030_s10, 4  ;;  %s2095_s2 = int_to_ptr.hbm [resolvable:$true] %s2094_s2 }
 0x433   :  { %v503_v39 = vrot.slane %v502_v28, 2  ;;  %v454_v26 = vpop.permute.xlu1 %453 }
 0x434   :  { %v463_v19 = vmul.f32 %v454_v26, %v2684_v5  ;;  %v553_v5 = vadd.f32 %v2774_v44, %v471_v46 }
 0x435   :  { %v504_v40 = vadd.f32 %v503_v39, %v502_v28 }
 0x436   :  { %v514_v43 = vsel %vm464_vm13, %v463_v19, 0.0  ;;  %v570_v42 = vsel %vm279_vm5, %v569_v63, %v553_v5  ;;  %vm4037_vm13 = vcmask 195712  }
 0x437   :  { %v515_v48 = vrot.slane %v514_v43, 4  ;;  %v505_v37 = vrot.slane %v504_v40, 1  ;;  %v572_v6 = vsel %vm4036_vm6, %v571_v61, %v570_v42  ;;  %v699_v42 = vperm.slane %v2657_v29, 3 }
 0x439   :  { %v516_v54 = vadd.f32 %v515_v48, %v514_v43  ;;  %v506_v0 = vadd.f32 %v505_v37, %v504_v40 }
 0x43b   :  { %v517_v59 = vrot.slane %v516_v54, 2  ;;  %v536_v60 = vpop.permute.xlu1 %535  ;;  %v558_v7 = vadd.f32 %v540_v52, %v506_v0 }
 0x43c   :  { %v556_v3 = vadd.f32 %v536_v60, %v492_v57 }
 0x43d   :  { %v518_v49 = vadd.f32 %v517_v59, %v516_v54  ;;  %v577_v16 = vrot.slane %v558_v7, 3 }
 0x43e   :  { %v573_v47 = vrot.slane %v556_v3, 5 }
 0x43f   :  { %v519_v2 = vrot.slane %v518_v49, 1 }
 0x440   :  { %v574_v44 = vsel %vm4035_vm7, %v573_v47, %v572_v6 }
 0x441   :  { %v520_v55 = vadd.f32 %v519_v2, %v518_v49  ;;  %v576_v15 = vsel %vm4034_vm8, %v575_v9, %v574_v44  ;;  %v686_v2 = vperm.slane %v2657_v29, 2 }
 0x442   :  { %v578_v4 = vsel %vm4033_vm9, %v577_v16, %v576_v15 }
 0x443   :  { %v542_v12 = vpop.permute.xlu1 %541  ;;  %v560_v13 = vadd.f32 %v544_v10, %v520_v55 }
 0x444   :  { %v559_v14 = vadd.f32 %v542_v12, %v513_v11 }
 0x445   :  { %v581_v18 = vrot.slane %v560_v13, 1 }
 0x446   :  { %v579_v17 = vrot.slane %v559_v14, 2 }
 0x448   :  { %v580_v21 = vsel %vm4032_vm10, %v579_v17, %v578_v4  ;;  %v2167_v4 = vld [vmem:[%s4026_s6 + $0x8] sm:$0xff] }
 0x449   :  { %v582_v22 = vsel %vm4031_vm11, %v581_v18, %v580_v21  ;;  %779 = vmatpush.bf16.msrb.mxu2 %v2167_v4 }
 0x44a   :  { %583 = vrot.lane.b32.xlu1 %v582_v22, %s2560_s11 }
 0x4bc   :  { %v584_v23 = vpop.permute.xlu1 %583 }
 0x4bd   :  { %v586_v24 = vsel %vm87_vm0, %v584_v23, 0.0 }
 0x4be   :  { %587 = vadd.xlane.f32.xlu0 %v586_v24 }
 0x4d2   :  { %850 = vperm.xlu0 %2499, %v847_v20  }
 0x531   :  { %v588_v25 = vpop.xlane.xlu0 %587 }
 0x532   :  { %v589_v27 = vmul.f32 %v588_v25, %v2621_v8 }
 0x534   :  { %v591_v28 = vrot.slane %v589_v27, 1  ;;  %v592_v32 = vrot.slane %v589_v27, 2  ;;  %v593_v34 = vrot.slane %v589_v27, 3  ;;  %v594_v35 = vrot.slane %v589_v27, 4 }
 0x535   :  { %v595_v38 = vrot.slane %v589_v27, 5  ;;  %v596_v39 = vrot.slane %v589_v27, 6  ;;  %v597_v26 = vrot.slane %v589_v27, 7  ;;  %v606_v30 = vsub.f32 %v553_v5, %v589_v27 }
 0x536   :  { %v2807_v19 = vsub.f32 %v554_v53, %v591_v28  ;;  %v2809_v41 = vsub.f32 %v555_v51, %v592_v32  ;;  %v2811_v40 = vsub.f32 %v556_v3, %v593_v34  ;;  %v2813_v31 = vsub.f32 %v557_v1, %v594_v35  ;;  %v2166_v28 = vld [vmem:[%s4026_s6] sm:$0xff] }
 0x537   :  { %v2815_v36 = vsub.f32 %v558_v7, %v595_v38  ;;  %v2817_v43 = vsub.f32 %v559_v14, %v596_v39  ;;  %v2819_v45 = vsub.f32 %v560_v13, %v597_v26  ;;  %v614_v53 = vmul.f32 %v606_v30, %v606_v30  ;;  %780 = vmatpush.bf16.msrb.mxu2 %v2166_v28 }
 0x538   :  { %v615_v46 = vmul.f32 %v2807_v19, %v2807_v19  ;;  %v616_v48 = vmul.f32 %v2809_v41, %v2809_v41  ;;  %v617_v51 = vmul.f32 %v2811_v40, %v2811_v40  ;;  %v618_v52 = vmul.f32 %v2813_v31, %v2813_v31 }
 0x539   :  { %v619_v37 = vmul.f32 %v2815_v36, %v2815_v36  ;;  %v620_v57 = vmul.f32 %v2817_v43, %v2817_v43  ;;  %v621_v58 = vmul.f32 %v2819_v45, %v2819_v45 }
 0x53a   :  { %v630_v54 = vrot.slane %v615_v46, 7  ;;  %v632_v56 = vrot.slane %v616_v48, 6  ;;  %v634_v59 = vrot.slane %v617_v51, 5  ;;  %v636_v61 = vrot.slane %v618_v52, 4 }
 0x53b   :  { %v638_v62 = vrot.slane %v619_v37, 3  ;;  %v640_v0 = vrot.slane %v620_v57, 2  ;;  %v642_v1 = vrot.slane %v621_v58, 1 }
 0x53c   :  { %v631_v5 = vsel %vm279_vm5, %v630_v54, %v614_v53 }
 0x53d   :  { %v633_v60 = vsel %vm4036_vm6, %v632_v56, %v631_v5 }
 0x53e   :  { %v635_v3 = vsel %vm4035_vm7, %v634_v59, %v633_v60 }
 0x53f   :  { %v637_v63 = vsel %vm4034_vm8, %v636_v61, %v635_v3 }
 0x540   :  { %v639_v49 = vsel %vm4033_vm9, %v638_v62, %v637_v63 }
 0x541   :  { %v641_v47 = vsel %vm4032_vm10, %v640_v0, %v639_v49 }
 0x542   :  { %v643_v50 = vsel %vm4031_vm11, %v642_v1, %v641_v47 }
 0x543   :  { %644 = vrot.lane.b32.xlu2 %v643_v50, %s2560_s11 }
 0x54b   :  { %688 = vrot.lane.b32.xlu2 %v686_v2, %s2559_s9 }
 0x553   :  { %701 = vrot.lane.b32.xlu2 %v699_v42, %s2559_s9 }
 0x59d   :  { %v645_v6 = vpop.permute.xlu2 %644 }
 0x59e   :  { %v647_v7 = vsel %vm87_vm0, %v645_v6, 0.0 }
 0x59f   :  { %648 = vadd.xlane.f32.xlu1 %v647_v7 }
 0x5a5   :  { %v689_v13 = vpop.permute.xlu2 %688 }
 0x5ad   :  { %v702_v39 = vpop.permute.xlu2 %701 }
 0x612   :  { %v649_v55 = vpop.xlane.xlu1 %648 }
 0x613   :  { %v650_v44 = vmul.f32 %v649_v55, %v2621_v8 }
 0x615   :  { %v651_v9 = vadd.f32 1e-05, %v650_v44 }
 0x617   :  { %2525 = vrsqrt.f32 %v651_v9  ;;  %vm658_vm15 = vweird.f32 %v651_v9 }
 0x61d   :  { %v2526_v10 = vpop.eup %2525 }
 0x61e   :  { %v653_v11 = vmul.f32 %v2526_v10, %v651_v9  ;;  %vm659_vm14 = vweird.f32 %v2526_v10 }
 0x61f   :  { %vm660_vm1 = vmor %vm658_vm15, %vm659_vm14  ;;  %vm1811_vm14 = vcmask 261312   ;;  %vm1815_vm15 = vcmask 326912  }
 0x620   :  { %v654_v12 = vmul.f32 %v2526_v10, %v653_v11 }
 0x622   :  { %v655_v14 = vmul.f32 0.5, %v654_v12 }
 0x624   :  { %v656_v15 = vsub.f32 1.5, %v655_v14 }
 0x626   :  { %v657_v16 = vmul.f32 %v2526_v10, %v656_v15 }
 0x628   :  { %v661_v17 = vsel %vm660_vm1, %v2526_v10, %v657_v16  ;;  %vm1819_vm1 = vcmask 392512  }
 0x629   :  { %v663_v18 = vrot.slane %v661_v17, 1  ;;  %v664_v21 = vrot.slane %v661_v17, 2  ;;  %v665_v22 = vrot.slane %v661_v17, 3  ;;  %v666_v23 = vrot.slane %v661_v17, 4 }
 0x62a   :  { %v678_v24 = vmul.f32 %v661_v17, %v606_v30  ;;  %v667_v20 = vrot.slane %v661_v17, 5  ;;  %v668_v25 = vrot.slane %v661_v17, 6  ;;  %v669_v27 = vrot.slane %v661_v17, 7 }
 0x62b   :  { %v679_v32 = vmul.f32 %v663_v18, %v2807_v19  ;;  %v680_v34 = vmul.f32 %v664_v21, %v2809_v41  ;;  %v681_v35 = vmul.f32 %v665_v22, %v2811_v40  ;;  %v682_v38 = vmul.f32 %v666_v23, %v2813_v31 }
 0x62c   :  { %v691_v26 = vmul.f32 %v689_v13, %v678_v24  ;;  %v683_v30 = vmul.f32 %v667_v20, %v2815_v36  ;;  %v684_v46 = vmul.f32 %v668_v25, %v2817_v43  ;;  %v685_v48 = vmul.f32 %v669_v27, %v2819_v45 }
 0x62d   :  { %v692_v51 = vmul.f32 %v689_v13, %v679_v32  ;;  %v693_v52 = vmul.f32 %v689_v13, %v680_v34  ;;  %v694_v53 = vmul.f32 %v689_v13, %v681_v35  ;;  %v695_v37 = vmul.f32 %v689_v13, %v682_v38 }
 0x62e   :  { %v704_v54 = vadd.f32 %v702_v39, %v691_v26  ;;  %v696_v19 = vmul.f32 %v689_v13, %v683_v30  ;;  %v697_v56 = vmul.f32 %v689_v13, %v684_v46  ;;  %v698_v41 = vmul.f32 %v689_v13, %v685_v48 }
 0x62f   :  { %v705_v40 = vadd.f32 %v702_v39, %v692_v51  ;;  %v706_v57 = vadd.f32 %v702_v39, %v693_v52  ;;  %v707_v31 = vadd.f32 %v702_v39, %v694_v53  ;;  %v708_v58 = vadd.f32 %v702_v39, %v695_v37  ;;  %v2169_v51 = vld [vmem:[%s4027_s7 + $0x8] sm:$0xff]  ;;  %v2168_v52 = vld [vmem:[%s4027_s7] sm:$0xff] }
 0x630   :  { %v712_v5 = vpack.c.bf16 %v704_v54, %v704_v54  ;;  %v709_v59 = vadd.f32 %v702_v39, %v696_v19  ;;  %v710_v36 = vadd.f32 %v702_v39, %v697_v56  ;;  %v711_v60 = vadd.f32 %v702_v39, %v698_v41  ;;  %814 = vmatpush.bf16.msra.mxu3 %v2169_v51 }
 0x631   :  { %v713_v43 = vpack.c.bf16 %v705_v40, %v705_v40  ;;  %v714_v61 = vpack.c.bf16 %v706_v57, %v706_v57  ;;  %v715_v45 = vpack.c.bf16 %v707_v31, %v707_v31  ;;  %v716_v3 = vpack.c.bf16 %v708_v58, %v708_v58 }
 0x632   :  { %v717_v62 = vpack.c.bf16 %v709_v59, %v709_v59  ;;  %v718_v63 = vpack.c.bf16 %v710_v36, %v710_v36  ;;  %v719_v49 = vpack.c.bf16 %v711_v60, %v711_v60  ;;  %v829_v2 = vrot.slane %v705_v40, 7  ;;  %v2502_v40 = vld [vmem:[%s4028_s8 + $0x8] ss:$0 sm:$0xff] }
 0x633   :  { %v734_v0 = vunpack.c.l.b16 %v713_v43  ;;  %v735_v1 = vunpack.c.l.b16 %v714_v61  ;;  %v736_v47 = vunpack.c.l.b16 %v715_v45  ;;  %v737_v50 = vunpack.c.l.b16 %v716_v3 }
 0x634   :  { %v733_v42 = vunpack.c.l.b16 %v712_v5  ;;  %v738_v6 = vunpack.c.l.b16 %v717_v62  ;;  %v739_v44 = vunpack.c.l.b16 %v718_v63  ;;  %v830_v9 = vsel %vm279_vm5, %v829_v2, %v704_v54  ;;  %815 = vmatpush.bf16.msra.mxu3 %v2168_v52 }
 0x635   :  { %v741_v7 = vrot.slane %v734_v0, 7  ;;  %v743_v55 = vrot.slane %v735_v1, 6  ;;  %v740_v10 = vunpack.c.l.b16 %v719_v49  ;;  %v745_v12 = vrot.slane %v736_v47, 5 }
 0x636   :  { %v831_v13 = vrot.slane %v706_v57, 6  ;;  %v747_v15 = vrot.slane %v737_v50, 4  ;;  %v749_v17 = vrot.slane %v738_v6, 3  ;;  %v833_v18 = vrot.slane %v707_v31, 5 }
 0x637   :  { %v742_v11 = vsel %vm279_vm5, %v741_v7, %v733_v42  ;;  %v751_v22 = vrot.slane %v739_v44, 2  ;;  %v753_v24 = vrot.slane %v740_v10, 1  ;;  %v835_v27 = vrot.slane %v708_v58, 4  ;;  %v2529_v7 = vld [vmem:[%s4028_s8] sm:$0xff] }
 0x638   :  { %v744_v14 = vsel %vm4036_vm6, %v743_v55, %v742_v11  ;;  %v832_v4 = vsel %vm4036_vm6, %v831_v13, %v830_v9  ;;  %v837_v35 = vrot.slane %v709_v59, 3  ;;  %v839_v39 = vrot.slane %v710_v36, 2  ;;  %v851_v59 = vpop.permute.xlu0 %850  ;;  %v2427_v11 = vld [vmem:[%s4023_s3 + $0x10] sm:$0xff]   ;;  %v2171_v13 = vld [vmem:[%s4023_s3] sm:$0xff]  }
 0x639   :  { %v746_v16 = vsel %vm4035_vm7, %v745_v12, %v744_v14  ;;  %v834_v20 = vsel %vm4035_vm7, %v833_v18, %v832_v4  ;;  %v841_v30 = vrot.slane %v711_v60, 1  ;;  %v724_v53 = vperm.slane %v2657_v29, 7  ;;  %v2426_v12 = vld [vmem:[%s4023_s3 + $0x8] sm:$0xff]   ;;  %v2428_v18 = vld [vmem:[%s4023_s3 + $0x18] sm:$0xff]  }
 0x63a   :  { %v748_v21 = vsel %vm4034_vm8, %v747_v15, %v746_v16  ;;  %v836_v34 = vsel %vm4034_vm8, %v835_v27, %v834_v20  ;;  %v876_v55 = vperm.slane %v2529_v7, 4  ;;  %v878_v9 = vperm.slane %v2529_v7, 5  ;;  %v2979_v7 = vld [vmem:[%s4023_s3 + $0x58] sm:$0xff]  }
 0x63b   :  { %v750_v23 = vsel %vm4033_vm9, %v749_v17, %v748_v21  ;;  %v838_v38 = vsel %vm4033_vm9, %v837_v35, %v836_v34  ;;  %v2181_v15 = vunpack.c.h.bf16 %v2427_v11  ;;  %v2176_v16 = vunpack.c.l.bf16 %v2426_v12 }
 0x63c   :  { %v752_v25 = vsel %vm4032_vm10, %v751_v22, %v750_v23  ;;  %v840_v26 = vsel %vm4032_vm10, %v839_v39, %v838_v38  ;;  %v2172_v17 = vunpack.c.l.bf16 %v2171_v13  ;;  %v2918_v22 = vld [vmem:[%s4023_s3 + $0x28] sm:$0xff]   ;;  %v2173_v34 = vunpack.c.h.bf16 %v2171_v13 }
 0x63d   :  { %v754_v28 = vsel %vm4031_vm11, %v753_v24, %v752_v25  ;;  %v842_v46 = vsel %vm4031_vm11, %v841_v30, %v840_v26  ;;  %v2185_v25 = vunpack.c.h.bf16 %v2428_v18  ;;  %v2429_v26 = vld [vmem:[%s4023_s3 + $0x20] sm:$0xff]   ;;  %v2432_v30 = vld [vmem:[%s4023_s3 + $0x38] sm:$0xff]   ;;  %vm1835_vm11 = vcmask 654912  }
 0x63e   :  { %v755_v32 = vpack.c.b16 %v754_v28, %v754_v28  ;;  %vm1839_vm10 = vcmask 720512   ;;  %vm1843_vm9 = vcmask 786112   ;;  %vm1847_vm8 = vcmask 851712  }
 0x63f   :  { %vm1851_vm7 = vcmask 917312   ;;  %vm1855_vm6 = vcmask 982912  }
 0x640   :  { %756 = vrot.lane.b32.xlu2 %v755_v32, %s2560_s11  ;;  %v2193_v32 = vunpack.c.h.bf16 %v2918_v22 }
 0x648   :  { %843 = vrot.lane.b32.xlu2 %v842_v46, %s2560_s11 }
 0x69a   :  { %v757_v48 = vpop.permute.xlu2 %756 }
 0x69b   :  { %2148 = vmatmul.msk.bf16.vlgmr.msrb.gmra.mxu2 %vm87_vm0, %v757_v48  ;;  %v2189_v48 = vunpack.c.h.bf16 %v2429_v26 }
 0x6a2   :  { %v844_v58 = vpop.permute.xlu2 %843 }
 0x71e   :  { %v782_v37 = vpop.f32.mrf.mxu2 }
 0x71f   :  { %v783_v54 = vadd.f32 %v782_v37, %v724_v53  ;;  %v2200_v53 = vunpack.c.l.bf16 %v2432_v30  ;;  %v2177_v37 = vunpack.c.h.bf16 %v2426_v12 }
 0x721   :  { %v786_v19 = vmax.f32 %v783_v54, 0.0 }
 0x723   :  { %v787_v56 = vpack.c.bf16 %v786_v19, %v786_v19 }
 0x725   :  { %2157 = vmatmul.msk.bf16.vlgmr.msra.gmra.mxu3 %vm87_vm0, %v787_v56 }
 0x726   :  { %v784_v41 = vpop.f32.mrf.mxu2 }
 0x7a8   :  { %v817_v57 = vpop.f32.mrf.mxu3 }
 0x7a9   :  { %v818_v31 = vadd.f32 %v2502_v40, %v817_v57  ;;  %v2945_v40 = vld [vmem:[%s4023_s3 + $0x30] sm:$0xff]   ;;  %v2950_v57 = vld [vmem:[%s4023_s3 + $0x40] sm:$0xff]  }
 0x7ab   :  { %v846_v5 = vadd.f32 %v844_v58, %v818_v31  ;;  %v2196_v58 = vunpack.c.l.bf16 %v2945_v40 }
 0x7ad   :  { %v853_v36 = vmul.f32 %v851_v59, %v846_v5  ;;  %v2180_v5 = vunpack.c.l.bf16 %v2427_v11  ;;  %v2217_v11 = vunpack.c.h.bf16 %v2979_v7 }
 0x7af   :  { %v854_v60 = vsel %vm87_vm0, %v853_v36, 0.0 }
 0x7b0   :  { %v819_v29 = vpop.f32.mrf.mxu3  ;;  %855 = vadd.xlane.f32.xlu2 %v854_v60 }
 0x7b1   :  { %v2205_v29 = vunpack.c.h.bf16 %v2950_v57 }
 0x823   :  { %v856_v43 = vpop.xlane.xlu2 %855 }
 0x824   :  { %v857_v61 = vmul.f32 %v856_v43, %v2621_v8 }
 0x826   :  { %v858_v45 = vsub.f32 %v853_v36, %v857_v61 }
 0x828   :  { %v859_v3 = vmul.f32 %v858_v45, %v858_v45 }
 0x82a   :  { %v860_v62 = vsel %vm87_vm0, %v859_v3, 0.0  ;;  %v2435_v3 = vld [vmem:[%s4023_s3 + $0x50] sm:$0xff]  }
 0x82b   :  { %861 = vadd.xlane.f32.xlu1 %v860_v62 }
 0x89e   :  { %v862_v63 = vpop.xlane.xlu1 %861 }
 0x89f   :  { %v863_v0 = vmul.f32 %v862_v63, %v2621_v8  ;;  %v2201_v63 = vunpack.c.h.bf16 %v2432_v30 }
 0x8a1   :  { %v864_v49 = vadd.f32 1e-05, %v863_v0 }
 0x8a3   :  { %2527 = vrsqrt.f32 %v864_v49  ;;  %vm871_vm3 = vweird.f32 %v864_v49 }
 0x8a9   :  { %v2528_v1 = vpop.eup %2527 }
 0x8aa   :  { %v866_v47 = vmul.f32 %v2528_v1, %v864_v49  ;;  %vm872_vm2 = vweird.f32 %v2528_v1 }
 0x8ab   :  { %vm873_vm4 = vmor %vm871_vm3, %vm872_vm2  ;;  %vm1823_vm2 = vcmask 458112   ;;  %vm1827_vm3 = vcmask 523712  }
 0x8ac   :  { %v867_v50 = vmul.f32 %v2528_v1, %v866_v47  ;;  %v2212_v47 = vunpack.c.l.bf16 %v2435_v3 }
 0x8ae   :  { %v868_v2 = vmul.f32 0.5, %v867_v50 }
 0x8b0   :  { %v869_v42 = vsub.f32 1.5, %v868_v2 }
 0x8b2   :  { %v870_v6 = vmul.f32 %v2528_v1, %v869_v42 }
 0x8b4   :  { %v874_v44 = vsel %vm873_vm4, %v2528_v1, %v870_v6  ;;  %v2184_v1 = vunpack.c.l.bf16 %v2428_v18  ;;  %v2974_v6 = vld [vmem:[%s4023_s3 + $0x48] sm:$0xff]   ;;  %v2213_v18 = vunpack.c.h.bf16 %v2435_v3  ;;  %vm1831_vm4 = vcmask 589312  }
 0x8b5   :  { %v875_v10 = vmul.f32 %v874_v44, %v858_v45  ;;  %v2208_v44 = vunpack.c.l.bf16 %v2974_v6  ;;  %v2209_v3 = vunpack.c.h.bf16 %v2974_v6 }
 0x8b7   :  { %v877_v8 = vmul.f32 %v876_v55, %v875_v10 }
 0x8b9   :  { %v2906_v14 = vadd.f32 %v878_v9, %v877_v8  ;;  %v2188_v8 = vunpack.c.l.bf16 %v2429_v26  ;;  %v2197_v26 = vunpack.c.h.bf16 %v2945_v40 }
 0x8bb   :  { %v2909_v4 = vperm.slane %v2906_v14, 0  ;;  %v1137_v19 = vrot.slane %v2906_v14, 1 }
 0x8bd   :  { %v1165_v21 = vmul.f32 %v2181_v15, %v2909_v4  ;;  %v1162_v23 = vmul.f32 %v2176_v16, %v2909_v4  ;;  %v1160_v24 = vmul.f32 %v2172_v17, %v2909_v4  ;;  %v1167_v35 = vmul.f32 %v2185_v25, %v2909_v4  ;;  %v2438_v16 = vld [vmem:[%s4023_s3 + $0x68] sm:$0xff]  }
 0x8be   :  { %v1171_v38 = vmul.f32 %v2193_v32, %v2909_v4  ;;  %v1161_v39 = vmul.f32 %v2173_v34, %v2909_v4  ;;  %v1169_v54 = vmul.f32 %v2189_v48, %v2909_v4  ;;  %v1174_v56 = vmul.f32 %v2200_v53, %v2909_v4  ;;  %v3002_v32 = vld [vmem:[%s4023_s3 + $0x60] sm:$0xff]   ;;  %v3007_v34 = vld [vmem:[%s4023_s3 + $0x70] sm:$0xff]  }
 0x8bf   :  { %v1303_v20 = vsel %vm87_vm0, %v1165_v21, 0.0  ;;  %v1294_v27 = vsel %vm87_vm0, %v1162_v23, 0.0  ;;  %v1288_v28 = vsel %vm87_vm0, %v1160_v24, 0.0  ;;  %v1309_v46 = vsel %vm87_vm0, %v1167_v35, 0.0  ;;  %v2441_v53 = vld [vmem:[%s4023_s3 + $0x80] sm:$0xff]  }
 0x8c0   :  { %1304 = vadd.xlane.f32.xlu2 %v1303_v20  ;;  %1295 = vadd.xlane.f32.xlu0 %v1294_v27  ;;  %v1321_v51 = vsel %vm87_vm0, %v1171_v38, 0.0  ;;  %v1291_v52 = vsel %vm87_vm0, %v1161_v39, 0.0  ;;  %v1163_v41 = vmul.f32 %v2177_v37, %v2909_v4  ;;  %v1315_v31 = vsel %vm87_vm0, %v1169_v54, 0.0 }
 0x8c1   :  { %1289 = vadd.xlane.f32.xlu1 %v1288_v28  ;;  %v2954_v59 = vperm.slane %v1137_v19, 0  ;;  %v1330_v36 = vsel %vm87_vm0, %v1174_v56, 0.0  ;;  %v1172_v43 = vmul.f32 %v2196_v58, %v2909_v4  ;;  %v1164_v61 = vmul.f32 %v2180_v5, %v2909_v4 }
 0x8c2   :  { %v1297_v60 = vsel %vm87_vm0, %v1163_v41, 0.0  ;;  %v1175_v50 = vmul.f32 %v2201_v63, %v2909_v4  ;;  %v1166_v2 = vmul.f32 %v2184_v1, %v2909_v4  ;;  %v1168_v13 = vmul.f32 %v2188_v8, %v2909_v4  ;;  %v2444_v1 = vld [vmem:[%s4023_s3 + $0x98] sm:$0xff]  }
 0x8c3   :  { %v1177_v45 = vmul.f32 %v2205_v29, %v2954_v59  ;;  %v1324_v62 = vsel %vm87_vm0, %v1172_v43, 0.0  ;;  %v1300_v0 = vsel %vm87_vm0, %v1164_v61, 0.0  ;;  %v1180_v42 = vmul.f32 %v2212_v47, %v2954_v59  ;;  %v2479_v47 = vld [vmem:[%s4023_s3 + $0x1b0] sm:$0xff]  }
 0x8c4   :  { %v1333_v55 = vsel %vm87_vm0, %v1175_v50, 0.0  ;;  %v1306_v9 = vsel %vm87_vm0, %v1166_v2, 0.0  ;;  %v1178_v12 = vmul.f32 %v2208_v44, %v2954_v59  ;;  %v1183_v15 = vmul.f32 %v2217_v11, %v2954_v59 }
 0x8c5   :  { %v1339_v49 = vsel %vm87_vm0, %v1177_v45, 0.0  ;;  %v1348_v10 = vsel %vm87_vm0, %v1180_v42, 0.0  ;;  %v1312_v21 = vsel %vm87_vm0, %v1168_v13, 0.0  ;;  %v2192_v24 = vunpack.c.l.bf16 %v2918_v22 }
 0x8c6   :  { %v1342_v17 = vsel %vm87_vm0, %v1178_v12, 0.0  ;;  %v1357_v23 = vsel %vm87_vm0, %v1183_v15, 0.0  ;;  %v2224_v20 = vunpack.c.l.bf16 %v2438_v16  ;;  %v1181_v25 = vmul.f32 %v2213_v18, %v2954_v59  ;;  %v3072_v15 = vld [vmem:[%s4023_s3 + $0x90] sm:$0xff]  }
 0x8c7   :  { %v1170_v27 = vmul.f32 %v2192_v24, %v2909_v4  ;;  %v2220_v35 = vunpack.c.l.bf16 %v3002_v32  ;;  %v2229_v30 = vunpack.c.h.bf16 %v3007_v34  ;;  %v1138_v48 = vrot.slane %v2906_v14, 2 }
 0x8c8   :  { %1310 = vadd.xlane.f32.xlu2 %v1309_v46  ;;  %1322 = vadd.xlane.f32.xlu0 %v1321_v51  ;;  %v1186_v28 = vmul.f32 %v2224_v20, %v2954_v59  ;;  %v1351_v22 = vsel %vm87_vm0, %v1181_v25, 0.0  ;;  %v1173_v51 = vmul.f32 %v2197_v26, %v2909_v4  ;;  %v2225_v54 = vunpack.c.h.bf16 %v2438_v16 }
 0x8c9   :  { %1292 = vadd.xlane.f32.xlu1 %v1291_v52  ;;  %v1318_v38 = vsel %vm87_vm0, %v1170_v27, 0.0  ;;  %v1184_v46 = vmul.f32 %v2220_v35, %v2954_v59  ;;  %v1189_v52 = vmul.f32 %v2229_v30, %v2954_v59  ;;  %v2236_v19 = vunpack.c.l.bf16 %v2441_v53 }
 0x8ca   :  { %v1366_v39 = vsel %vm87_vm0, %v1186_v28, 0.0  ;;  %v3023_v56 = vperm.slane %v1138_v48, 0  ;;  %v1327_v41 = vsel %vm87_vm0, %v1173_v51, 0.0  ;;  %v1187_v4 = vmul.f32 %v2225_v54, %v2954_v59  ;;  %v2447_v28 = vld [vmem:[%s4023_s3 + $0xb0] sm:$0xff]   ;;  %v3101_v51 = vld [vmem:[%s4023_s3 + $0xa8] sm:$0xff]  }
 0x8cb   :  { %v1360_v37 = vsel %vm87_vm0, %v1184_v46, 0.0  ;;  %v1375_v40 = vsel %vm87_vm0, %v1189_v52, 0.0  ;;  %v2237_v42 = vunpack.c.h.bf16 %v2441_v53  ;;  %v2248_v44 = vunpack.c.l.bf16 %v2444_v1  ;;  %v3106_v52 = vld [vmem:[%s4023_s3 + $0xb8] sm:$0xff]  }
 0x8cc   :  { %v1192_v58 = vmul.f32 %v2236_v19, %v3023_v56  ;;  %v2221_v24 = vunpack.c.h.bf16 %v3002_v32  ;;  %v2249_v35 = vunpack.c.h.bf16 %v2444_v1  ;;  %v2228_v26 = vunpack.c.l.bf16 %v3007_v34 }
 0x8cd   :  { %v1193_v8 = vmul.f32 %v2237_v42, %v3023_v56  ;;  %v1198_v12 = vmul.f32 %v2248_v44, %v3023_v56  ;;  %v2256_v53 = vunpack.c.l.bf16 %v3101_v51  ;;  %v2265_v19 = vunpack.c.h.bf16 %v3106_v52 }
 0x8ce   :  { %v1384_v43 = vsel %vm87_vm0, %v1192_v58, 0.0  ;;  %v1185_v27 = vmul.f32 %v2221_v24, %v2954_v59  ;;  %v1199_v30 = vmul.f32 %v2249_v35, %v3023_v56  ;;  %v1188_v48 = vmul.f32 %v2228_v26, %v2954_v59 }
 0x8cf   :  { %v1387_v16 = vsel %vm87_vm0, %v1193_v8, 0.0  ;;  %v1402_v18 = vsel %vm87_vm0, %v1198_v12, 0.0  ;;  %v3159_v24 = vadd.s32 4294967288, %v2702_v33 }
 0x8d0   :  { %1316 = vadd.xlane.f32.xlu2 %v1315_v31  ;;  %1331 = vadd.xlane.f32.xlu0 %v1330_v36  ;;  %v2204_v31 = vunpack.c.l.bf16 %v2950_v57  ;;  %v3034_v36 = vld [vmem:[%s4023_s3 + $0x78] sm:$0xff]   ;;  %v1369_v57 = vsel %vm87_vm0, %v1187_v4, 0.0  ;;  %v1363_v32 = vsel %vm87_vm0, %v1185_v27, 0.0  ;;  %v1405_v34 = vsel %vm87_vm0, %v1199_v30, 0.0 }
 0x8d1   :  { %1298 = vadd.xlane.f32.xlu1 %v1297_v60  ;;  %v3039_v60 = vld [vmem:[%s4023_s3 + $0x88] sm:$0xff]   ;;  %v2232_v29 = vunpack.c.l.bf16 %v3034_v36  ;;  %v1372_v54 = vsel %vm87_vm0, %v1188_v48, 0.0  ;;  %v1207_v4 = vmul.f32 %v2265_v19, %v3023_v56 }
 0x8d2   :  { %v1176_v5 = vmul.f32 %v2204_v31, %v2954_v59  ;;  %v2241_v45 = vunpack.c.h.bf16 %v3039_v60  ;;  %v1139_v31 = vrot.slane %v2906_v14, 3 }
 0x8d3   :  { %v1190_v63 = vmul.f32 %v2232_v29, %v2954_v59  ;;  %v2261_v29 = vunpack.c.h.bf16 %v2447_v28 }
 0x8d4   :  { %v1336_v61 = vsel %vm87_vm0, %v1176_v5, 0.0  ;;  %v2450_v5 = vld [vmem:[%s4023_s3 + $0xc8] sm:$0xff]  }
 0x8d5   :  { %v1378_v2 = vsel %vm87_vm0, %v1190_v63, 0.0 }
 0x8d8   :  { %1325 = vadd.xlane.f32.xlu2 %v1324_v62  ;;  %1340 = vadd.xlane.f32.xlu0 %v1339_v49  ;;  %v1142_v62 = vrot.slane %v2906_v14, 6  ;;  %v1179_v49 = vmul.f32 %v2209_v3, %v2954_v59  ;;  %v2240_v3 = vunpack.c.l.bf16 %v3039_v60 }
 0x8d9   :  { %1301 = vadd.xlane.f32.xlu1 %v1300_v0  ;;  %v1195_v0 = vmul.f32 %v2241_v45, %v3023_v56 }
 0x8da   :  { %v3057_v50 = vperm.slane %v1142_v62, 0  ;;  %v1194_v63 = vmul.f32 %v2240_v3, %v3023_v56 }
 0x8db   :  { %v1393_v6 = vsel %vm87_vm0, %v1195_v0, 0.0  ;;  %v3133_v0 = vld [vmem:[%s4023_s3 + $0xc0] sm:$0xff]  }
 0x8dc   :  { %v2268_v1 = vunpack.c.l.bf16 %v3133_v0 }
 0x8e0   :  { %1334 = vadd.xlane.f32.xlu2 %v1333_v55  ;;  %1349 = vadd.xlane.f32.xlu0 %v1348_v10  ;;  %v1345_v55 = vsel %vm87_vm0, %v1179_v49, 0.0  ;;  %v2389_v10 = vunpack.c.h.bf16 %v2479_v47  ;;  %v3138_v49 = vld [vmem:[%s4023_s3 + $0xd0] sm:$0xff]  }
 0x8e1   :  { %1307 = vadd.xlane.f32.xlu1 %v1306_v9  ;;  %v2216_v9 = vunpack.c.l.bf16 %v2979_v7  ;;  %v3077_v7 = vld [vmem:[%s4023_s3 + $0xa0] sm:$0xff]   ;;  %v2277_v42 = vunpack.c.h.bf16 %v3138_v49 }
 0x8e2   :  { %v3065_v11 = vmul.f32 %v2389_v10, %v3057_v50 }
 0x8e3   :  { %v1182_v13 = vmul.f32 %v2216_v9, %v2954_v59 }
 0x8e8   :  { %1343 = vadd.xlane.f32.xlu2 %v1342_v17  ;;  %1358 = vadd.xlane.f32.xlu0 %v1357_v23  ;;  %v2244_v17 = vunpack.c.l.bf16 %v3072_v15  ;;  %v2253_v23 = vunpack.c.h.bf16 %v3077_v7 }
 0x8e9   :  { %1313 = vadd.xlane.f32.xlu1 %v1312_v21  ;;  %v1354_v21 = vsel %vm87_vm0, %v1182_v13, 0.0  ;;  %v2453_v13 = vld [vmem:[%s4023_s3 + $0xe0] sm:$0xff]  }
 0x8ea   :  { %v1196_v20 = vmul.f32 %v2244_v17, %v3023_v56  ;;  %v1201_v25 = vmul.f32 %v2253_v23, %v3023_v56  ;;  %v2273_v17 = vunpack.c.h.bf16 %v2450_v5  ;;  %v2252_v23 = vunpack.c.l.bf16 %v3077_v7 }
 0x8eb   :  { %v2285_v3 = vunpack.c.h.bf16 %v2453_v13 }
 0x8ec   :  { %v1200_v7 = vmul.f32 %v2252_v23, %v3023_v56 }
 0x8f0   :  { %1352 = vadd.xlane.f32.xlu2 %v1351_v22  ;;  %1367 = vadd.xlane.f32.xlu0 %v1366_v39  ;;  %v1396_v22 = vsel %vm87_vm0, %v1196_v20, 0.0  ;;  %v2260_v39 = vunpack.c.l.bf16 %v2447_v28  ;;  %v3162_v20 = vadd.s32 4294967280, %v2702_v33 }
 0x8f1   :  { %1319 = vadd.xlane.f32.xlu1 %v1318_v38  ;;  %v1411_v38 = vsel %vm87_vm0, %v1201_v25, 0.0 }
 0x8f2   :  { %v1204_v46 = vmul.f32 %v2260_v39, %v3023_v56 }
 0x8f8   :  { %1361 = vadd.xlane.f32.xlu2 %v1360_v37  ;;  %1376 = vadd.xlane.f32.xlu0 %v1375_v40  ;;  %v1420_v37 = vsel %vm87_vm0, %v1204_v46, 0.0  ;;  %v1202_v40 = vmul.f32 %v2256_v53, %v3023_v56 }
 0x8f9   :  { %1328 = vadd.xlane.f32.xlu1 %v1327_v41  ;;  %v2233_v41 = vunpack.c.h.bf16 %v3034_v36  ;;  %v1429_v36 = vsel %vm87_vm0, %v1207_v4, 0.0 }
 0x8fb   :  { %v1191_v58 = vmul.f32 %v2233_v41, %v2954_v59  ;;  %v1205_v59 = vmul.f32 %v2261_v29, %v3023_v56  ;;  %v2257_v41 = vunpack.c.h.bf16 %v3101_v51  ;;  %v3206_v51 = vld [vmem:[%s4023_s3 + $0xf8] sm:$0xff]  }
 0x8fd   :  { %v1381_v45 = vsel %vm87_vm0, %v1191_v58, 0.0  ;;  %v1423_v60 = vsel %vm87_vm0, %v1205_v59, 0.0  ;;  %v1203_v29 = vmul.f32 %v2257_v41, %v3023_v56  ;;  %v2297_v41 = vunpack.c.h.bf16 %v3206_v51 }
 0x900   :  { %1370 = vadd.xlane.f32.xlu2 %v1369_v57  ;;  %1385 = vadd.xlane.f32.xlu0 %v1384_v43  ;;  %v1414_v57 = vsel %vm87_vm0, %v1202_v40, 0.0  ;;  %v2272_v43 = vunpack.c.l.bf16 %v2450_v5  ;;  %v3193_v40 = vadd.s32 4294967272, %v2702_v33 }
 0x901   :  { %1337 = vadd.xlane.f32.xlu1 %v1336_v61  ;;  %v3122_v61 = vperm.slane %v1139_v31, 0 }
 0x903   :  { %v1210_v62 = vmul.f32 %v2272_v43, %v3122_v61  ;;  %v1208_v44 = vmul.f32 %v2268_v1, %v3122_v61  ;;  %v1213_v8 = vmul.f32 %v2277_v42, %v3122_v61  ;;  %v1211_v27 = vmul.f32 %v2273_v17, %v3122_v61 }
 0x904   :  { %v3215_v1 = vadd.s32 4294967264, %v2702_v33  ;;  %v1217_v42 = vmul.f32 %v2285_v3, %v3122_v61  ;;  %v3292_v3 = vld [vmem:[%s4023_s3 + $0x108] sm:$0xff]  }
 0x905   :  { %v1438_v47 = vsel %vm87_vm0, %v1210_v62, 0.0  ;;  %v1441_v48 = vsel %vm87_vm0, %v1211_v27, 0.0  ;;  %v1417_v62 = vsel %vm87_vm0, %v1203_v29, 0.0 }
 0x908   :  { %1379 = vadd.xlane.f32.xlu2 %v1378_v2  ;;  %1394 = vadd.xlane.f32.xlu0 %v1393_v6  ;;  %v1390_v2 = vsel %vm87_vm0, %v1194_v63, 0.0  ;;  %v2245_v6 = vunpack.c.h.bf16 %v3072_v15  ;;  %v1447_v15 = vsel %vm87_vm0, %v1213_v8, 0.0  ;;  %v2296_v63 = vunpack.c.l.bf16 %v3206_v51 }
 0x909   :  { %1346 = vadd.xlane.f32.xlu1 %v1345_v55 }
 0x90a   :  { %v1197_v12 = vmul.f32 %v2245_v6, %v3023_v56  ;;  %v3226_v6 = vld [vmem:[%s4023_s3 + $0xf0] sm:$0xff]  }
 0x90b   :  { %v2292_v17 = vunpack.c.l.bf16 %v3226_v6 }
 0x910   :  { %1388 = vadd.xlane.f32.xlu2 %v1387_v16  ;;  %1403 = vadd.xlane.f32.xlu0 %v1402_v18  ;;  %v1432_v16 = vsel %vm87_vm0, %v1208_v44, 0.0  ;;  %v1399_v18 = vsel %vm87_vm0, %v1197_v12, 0.0  ;;  %v1140_v44 = vrot.slane %v2906_v14, 4  ;;  %v3236_v12 = vld [vmem:[%s4023_s3 + $0x100] sm:$0xff]  }
 0x911   :  { %1355 = vadd.xlane.f32.xlu1 %v1354_v21  ;;  %v2284_v21 = vunpack.c.l.bf16 %v2453_v13 }
 0x912   :  { %v3246_v23 = vperm.slane %v1140_v44, 0 }
 0x913   :  { %v1216_v35 = vmul.f32 %v2284_v21, %v3122_v61  ;;  %v2301_v21 = vunpack.c.h.bf16 %v3236_v12 }
 0x918   :  { %1397 = vadd.xlane.f32.xlu2 %v1396_v22  ;;  %1412 = vadd.xlane.f32.xlu0 %v1411_v38  ;;  %v3174_v38 = vld [vmem:[%s4023_s3 + $0xd8] sm:$0xff]  }
 0x919   :  { %1364 = vadd.xlane.f32.xlu1 %v1363_v32  ;;  %v3179_v32 = vld [vmem:[%s4023_s3 + $0xe8] sm:$0xff]  }
 0x91a   :  { %v2289_v53 = vunpack.c.h.bf16 %v3179_v32 }
 0x920   :  { %1406 = vadd.xlane.f32.xlu2 %v1405_v34  ;;  %1421 = vadd.xlane.f32.xlu0 %v1420_v37  ;;  %v2280_v34 = vunpack.c.l.bf16 %v3174_v38  ;;  %v1456_v37 = vsel %vm87_vm0, %v1216_v35, 0.0 }
 0x921   :  { %1373 = vadd.xlane.f32.xlu1 %v1372_v54  ;;  %v1408_v54 = vsel %vm87_vm0, %v1200_v7, 0.0  ;;  %v3255_v7 = vadd.s32 4294967240, %v2702_v33 }
 0x922   :  { %v1214_v4 = vmul.f32 %v2280_v34, %v3122_v61  ;;  %v3267_v34 = vld [vmem:[%s4023_s3 + $0x110] sm:$0xff]  }
 0x928   :  { %1415 = vadd.xlane.f32.xlu2 %v1414_v57  ;;  %1430 = vadd.xlane.f32.xlu0 %v1429_v36  ;;  %v1219_v57 = vmul.f32 %v2289_v53, %v3122_v61 }
 0x929   :  { %1382 = vadd.xlane.f32.xlu1 %v1381_v45  ;;  %v1450_v45 = vsel %vm87_vm0, %v1214_v4, 0.0  ;;  %v2308_v4 = vunpack.c.l.bf16 %v3267_v34 }
 0x92a   :  { %v1465_v59 = vsel %vm87_vm0, %v1219_v57, 0.0 }
 0x930   :  { %1424 = vadd.xlane.f32.xlu2 %v1423_v60  ;;  %1439 = vadd.xlane.f32.xlu0 %v1438_v47  ;;  %v2264_v60 = vunpack.c.l.bf16 %v3106_v52  ;;  %v3218_v47 = vadd.s32 4294967256, %v2702_v33 }
 0x931   :  { %1391 = vadd.xlane.f32.xlu1 %v1390_v2 }
 0x932   :  { %v1206_v8 = vmul.f32 %v2264_v60, %v3023_v56  ;;  %v2269_v56 = vunpack.c.h.bf16 %v3133_v0  ;;  %v1220_v0 = vmul.f32 %v2292_v17, %v3122_v61  ;;  %v3301_v60 = vld [vmem:[%s4023_s3 + $0x118] sm:$0xff]  }
 0x933   :  { %v3146_v55 = vpop.xlane.xlu2 %1304  ;;  %v1296_v9 = vpop.xlane.xlu0 %1295 }
 0x934   :  { %v1290_v10 = vpop.xlane.xlu1 %1289  ;;  %v1806_v30 = vperm.slane %v1296_v9, %v3162_v20 }
 0x935   :  { %v1800_v39 = vperm.slane %v1290_v10, %v2702_v33  ;;  %v1222_v10 = vmul.f32 %v2296_v63, %v3122_v61 }
 0x937   :  { %v1474_v27 = vsel %vm87_vm0, %v1222_v10, 0.0 }
 0x938   :  { %1433 = vadd.xlane.f32.xlu2 %v1432_v16  ;;  %1448 = vadd.xlane.f32.xlu0 %v1447_v15  ;;  %v1818_v16 = vperm.slane %v3146_v55, %v3218_v47  ;;  %v3252_v55 = vadd.s32 4294967248, %v2702_v33 }
 0x939   :  { %1400 = vadd.xlane.f32.xlu1 %v1399_v18  ;;  %v1459_v18 = vsel %vm87_vm0, %v1217_v42, 0.0 }
 0x93b   :  { %v3164_v25 = vpop.xlane.xlu2 %1310  ;;  %v3167_v28 = vpop.xlane.xlu0 %1322 }
 0x93c   :  { %v1293_v22 = vpop.xlane.xlu1 %1292 }
 0x93d   :  { %v1802_v26 = vperm.slane %v1293_v22, %v3159_v24  ;;  %v1426_v22 = vsel %vm87_vm0, %v1206_v8, 0.0 }
 0x93f   :  { %v1804_v46 = vsel %vm1803_vm12, %v1802_v26, %v1800_v39 }
 0x940   :  { %1442 = vadd.xlane.f32.xlu2 %v1441_v48  ;;  %v1808_v19 = vsel %vm4037_vm13, %v1806_v30, %v1804_v46  ;;  %1457 = vadd.xlane.f32.xlu0 %v1456_v37  ;;  %v1225_v46 = vmul.f32 %v2301_v21, %v3246_v23  ;;  %v1209_v48 = vmul.f32 %v2269_v56, %v3122_v61  ;;  %v3318_v21 = vadd.s32 4294967208, %v2702_v33 }
 0x941   :  { %1409 = vadd.xlane.f32.xlu1 %v1408_v54  ;;  %v1826_v37 = vperm.slane %v3164_v25, %v3255_v7  ;;  %v3281_v25 = vadd.s32 4294967232, %v2702_v33 }
 0x942   :  { %v1435_v57 = vsel %vm87_vm0, %v1209_v48, 0.0 }
 0x943   :  { %v3195_v31 = vpop.xlane.xlu2 %1316  ;;  %v3198_v58 = vpop.xlane.xlu0 %1331 }
 0x944   :  { %v1299_v5 = vpop.xlane.xlu1 %1298 }
 0x945   :  { %v1810_v43 = vperm.slane %v1299_v5, %v3193_v40  ;;  %v1483_v5 = vsel %vm87_vm0, %v1225_v46, 0.0  ;;  %v3333_v46 = vld [vmem:[%s4023_s3 + $0x128] sm:$0xff]  }
 0x947   :  { %v1812_v36 = vsel %vm1811_vm14, %v1810_v43, %v1808_v19  ;;  %v1468_v19 = vsel %vm87_vm0, %v1220_v0, 0.0  ;;  %v2276_v43 = vunpack.c.l.bf16 %v3138_v49 }
 0x948   :  { %1451 = vadd.xlane.f32.xlu2 %v1450_v45  ;;  %1466 = vadd.xlane.f32.xlu0 %v1465_v59  ;;  %v1223_v45 = vmul.f32 %v2297_v41, %v3122_v61  ;;  %v2309_v41 = vunpack.c.h.bf16 %v3267_v34  ;;  %v3353_v34 = vadd.s32 4294967184, %v2702_v33 }
 0x949   :  { %1418 = vadd.xlane.f32.xlu1 %v1417_v62  ;;  %v1228_v62 = vmul.f32 %v2308_v4, %v3246_v23  ;;  %v1212_v63 = vmul.f32 %v2276_v43, %v3122_v61  ;;  %v2320_v4 = vunpack.c.l.bf16 %v3333_v46 }
 0x94a   :  { %v1477_v8 = vsel %vm87_vm0, %v1223_v45, 0.0 }
 0x94b   :  { %v3220_v2 = vpop.xlane.xlu2 %1325  ;;  %v3229_v9 = vpop.xlane.xlu0 %1340  ;;  %v1444_v17 = vsel %vm87_vm0, %v1212_v63, 0.0 }
 0x94c   :  { %v1302_v52 = vpop.xlane.xlu1 %1301 }
 0x94d   :  { %v1814_v13 = vperm.slane %v1302_v52, %v3215_v1  ;;  %v2304_v52 = vunpack.c.l.bf16 %v3292_v3 }
 0x94f   :  { %v1816_v15 = vsel %vm1815_vm15, %v1814_v13, %v1812_v36  ;;  %v3284_v36 = vadd.s32 4294967224, %v2702_v33  ;;  %v2313_v13 = vunpack.c.h.bf16 %v3301_v60  ;;  %v1226_v56 = vmul.f32 %v2304_v52, %v3246_v23  ;;  %v3370_v52 = vld [vmem:[%s4023_s3 + $0x130] sm:$0xff]  }
 0x950   :  { %1460 = vadd.xlane.f32.xlu2 %v1459_v18  ;;  %v1820_v35 = vsel %vm1819_vm1, %v1818_v16, %v1816_v15  ;;  %1475 = vadd.xlane.f32.xlu0 %v1474_v27  ;;  %v1492_v16 = vsel %vm87_vm0, %v1228_v62, 0.0  ;;  %v2281_v18 = vunpack.c.h.bf16 %v3174_v38  ;;  %v3322_v27 = vadd.s32 4294967200, %v2702_v33 }
 0x951   :  { %1427 = vadd.xlane.f32.xlu1 %v1426_v22  ;;  %v1834_v44 = vperm.slane %v3195_v31, %v3284_v36  ;;  %v3315_v31 = vadd.s32 4294967216, %v2702_v33  ;;  %v1231_v38 = vmul.f32 %v2313_v13, %v3246_v23 }
 0x953   :  { %v3257_v39 = vpop.xlane.xlu2 %1334  ;;  %v3260_v30 = vpop.xlane.xlu0 %1349 }
 0x954   :  { %v1308_v26 = vpop.xlane.xlu1 %1307 }
 0x955   :  { %v1822_v53 = vperm.slane %v1308_v26, %v3252_v55  ;;  %v1215_v26 = vmul.f32 %v2281_v18, %v3122_v61 }
 0x957   :  { %v1824_v54 = vsel %vm1823_vm2, %v1822_v53, %v1820_v35  ;;  %v1842_v53 = vperm.slane %v3167_v28, %v3318_v21  ;;  %v2288_v28 = vunpack.c.l.bf16 %v3179_v32  ;;  %v1234_v32 = vmul.f32 %v2320_v4, %v3246_v23 }
 0x958   :  { %1469 = vadd.xlane.f32.xlu2 %v1468_v19  ;;  %v1828_v29 = vsel %vm1827_vm3, %v1826_v37, %v1824_v54  ;;  %1484 = vadd.xlane.f32.xlu0 %v1483_v5  ;;  %v1486_v37 = vsel %vm87_vm0, %v1226_v56, 0.0  ;;  %v1846_v54 = vperm.slane %v3220_v2, %v3322_v27  ;;  %v3350_v2 = vadd.s32 4294967192, %v2702_v33 }
 0x959   :  { %1436 = vadd.xlane.f32.xlu1 %v1435_v57  ;;  %v1501_v57 = vsel %vm87_vm0, %v1231_v38, 0.0  ;;  %v1510_v56 = vsel %vm87_vm0, %v1234_v32, 0.0  ;;  %v2293_v38 = vunpack.c.h.bf16 %v3226_v6  ;;  %v3395_v6 = vld [vmem:[%s4023_s3 + $0x140] sm:$0xff]  }
 0x95a   :  { %v2332_v32 = vunpack.c.l.bf16 %v3395_v6 }
 0x95b   :  { %v3286_v51 = vpop.xlane.xlu2 %1343  ;;  %v3294_v49 = vpop.xlane.xlu0 %1358 }
 0x95c   :  { %v1314_v59 = vpop.xlane.xlu1 %1313 }
 0x95d   :  { %v1830_v42 = vperm.slane %v1314_v59, %v3281_v25  ;;  %v1229_v59 = vmul.f32 %v2309_v41, %v3246_v23  ;;  %v1862_v41 = vperm.slane %v3229_v9, %v3159_v24 }
 0x95f   :  { %v1832_v10 = vsel %vm1831_vm4, %v1830_v42, %v1828_v29  ;;  %v1453_v29 = vsel %vm87_vm0, %v1215_v26, 0.0  ;;  %v1218_v42 = vmul.f32 %v2288_v28, %v3122_v61  ;;  %v3403_v28 = vadd.s32 4294967176, %v2702_v33 }
 0x960   :  { %1478 = vadd.xlane.f32.xlu2 %v1477_v8  ;;  %v1836_v15 = vsel %vm1835_vm11, %v1834_v44, %v1832_v10  ;;  %1493 = vadd.xlane.f32.xlu0 %v1492_v16  ;;  %v3365_v44 = vld [vmem:[%s4023_s3 + $0x120] sm:$0xff]   ;;  %v1854_v8 = vperm.slane %v3198_v58, %v3353_v34  ;;  %v1495_v16 = vsel %vm87_vm0, %v1229_v59, 0.0  ;;  %v1141_v58 = vrot.slane %v2906_v14, 5 }
 0x961   :  { %1445 = vadd.xlane.f32.xlu1 %v1444_v17  ;;  %v2316_v17 = vunpack.c.l.bf16 %v3365_v44 }
 0x963   :  { %v3324_v22 = vpop.xlane.xlu2 %1352  ;;  %v3326_v0 = vpop.xlane.xlu0 %1367 }
 0x964   :  { %v1320_v35 = vpop.xlane.xlu1 %1319 }
 0x965   :  { %v1838_v48 = vperm.slane %v1320_v35, %v3315_v31  ;;  %v1462_v35 = vsel %vm87_vm0, %v1218_v42, 0.0 }
 0x967   :  { %v1840_v19 = vsel %vm1839_vm10, %v1838_v48, %v1836_v15  ;;  %v2325_v15 = vunpack.c.h.bf16 %v3370_v52  ;;  %v1232_v48 = vmul.f32 %v2316_v17, %v3246_v23 }
 0x968   :  { %v1844_v5 = vsel %vm1843_vm9, %v1842_v53, %v1840_v19  ;;  %1487 = vadd.xlane.f32.xlu2 %v1486_v37  ;;  %1502 = vadd.xlane.f32.xlu0 %v1501_v57  ;;  %v1221_v19 = vmul.f32 %v2293_v38, %v3122_v61  ;;  %v1864_v57 = vperm.slane %v3286_v51, %v3162_v20  ;;  %v2300_v51 = vunpack.c.l.bf16 %v3236_v12 }
 0x969   :  { %1454 = vadd.xlane.f32.xlu1 %v1453_v29  ;;  %v1848_v43 = vsel %vm1847_vm8, %v1846_v54, %v1844_v5  ;;  %v1237_v53 = vmul.f32 %v2325_v15, %v3246_v23  ;;  %v3397_v5 = vperm.slane %v1141_v58, 0  ;;  %v2321_v29 = vunpack.c.h.bf16 %v3333_v46 }
 0x96a   :  { %v1504_v9 = vsel %vm87_vm0, %v1232_v48, 0.0  ;;  %v1471_v59 = vsel %vm87_vm0, %v1221_v19, 0.0  ;;  %v1858_v46 = vperm.slane %v3257_v39, %v3403_v28  ;;  %v1224_v12 = vmul.f32 %v2300_v51, %v3246_v23  ;;  %v3429_v39 = vld [vmem:[%s4023_s3 + $0x148] sm:$0xff]  }
 0x96b   :  { %v3355_v45 = vpop.xlane.xlu2 %1361  ;;  %v3358_v63 = vpop.xlane.xlu0 %1376  ;;  %v1240_v17 = vmul.f32 %v2332_v32, %v3397_v5  ;;  %v1870_v58 = vperm.slane %v3324_v22, %v3218_v47  ;;  %v1874_v51 = vperm.slane %v3294_v49, %v3255_v7 }
 0x96c   :  { %v1329_v62 = vpop.xlane.xlu1 %1328 }
 0x96d   :  { %v1850_v10 = vperm.slane %v1329_v62, %v3350_v2 }
 0x96f   :  { %v1852_v13 = vsel %vm1851_vm7, %v1850_v10, %v1848_v43  ;;  %v1519_v43 = vsel %vm87_vm0, %v1237_v53, 0.0  ;;  %v1235_v10 = vmul.f32 %v2321_v29, %v3246_v23 }
 0x970   :  { %v1856_v18 = vsel %vm1855_vm6, %v1854_v8, %v1852_v13  ;;  %1496 = vadd.xlane.f32.xlu2 %v1495_v16  ;;  %1511 = vadd.xlane.f32.xlu0 %v1510_v56  ;;  %v3420_v8 = vld [vmem:[%s4023_s3 + $0x138] sm:$0xff]  }
 0x971   :  { %1463 = vadd.xlane.f32.xlu1 %v1462_v35  ;;  %v1868_v35 = vperm.slane %v3260_v30, %v3215_v1  ;;  %v2328_v38 = vunpack.c.l.bf16 %v3420_v8  ;;  %v1513_v53 = vsel %vm87_vm0, %v1235_v10, 0.0  ;;  %v2305_v30 = vunpack.c.h.bf16 %v3292_v3  ;;  %v3458_v3 = vld [vmem:[%s4023_s3 + $0x158] sm:$0xff]  }
 0x972   :  { %v1876_v10 = vperm.slane %v3355_v45, %v3281_v25 }
 0x973   :  { %v3384_v26 = vpop.xlane.xlu2 %1370  ;;  %v1386_v37 = vpop.xlane.xlu0 %1385 }
 0x974   :  { %v1338_v54 = vpop.xlane.xlu1 %1337  ;;  %v1892_v29 = vperm.slane %v1386_v37, %v2702_v33 }
 0x975   :  { %v1861_v4 = vperm.slane %v1338_v54, %v2702_v33  ;;  %v2337_v54 = vunpack.c.h.bf16 %v3429_v39 }
 0x977   :  { %v1863_v61 = vsel %vm1803_vm12, %v1862_v41, %v1861_v4  ;;  %v1480_v41 = vsel %vm87_vm0, %v1224_v12, 0.0  ;;  %v2344_v12 = vunpack.c.l.bf16 %v3458_v3 }
 0x978   :  { %1505 = vadd.xlane.f32.xlu2 %v1504_v9  ;;  %v1865_v62 = vsel %vm4037_vm13, %v1864_v57, %v1863_v61  ;;  %1520 = vadd.xlane.f32.xlu0 %v1519_v43  ;;  %vm4038_vm13 = vcmask 1048512   ;;  %v1238_v57 = vmul.f32 %v2328_v38, %v3246_v23  ;;  %v2312_v38 = vunpack.c.l.bf16 %v3301_v60 }
 0x979   :  { %1472 = vadd.xlane.f32.xlu1 %v1471_v59  ;;  %v3433_v56 = vsel %vm4038_vm13, %v1858_v46, %v1856_v18  ;;  %v1528_v18 = vsel %vm87_vm0, %v1240_v17, 0.0  ;;  %v1243_v59 = vmul.f32 %v2337_v54, %v3397_v5  ;;  %v2333_v46 = vunpack.c.h.bf16 %v3395_v6 }
 0x97a   :  { %v1522_v17 = vsel %vm87_vm0, %v1238_v57, 0.0 }
 0x97b   :  { %v3414_v42 = vpop.xlane.xlu2 %1379  ;;  %v3422_v13 = vpop.xlane.xlu0 %1394  ;;  %v1241_v45 = vmul.f32 %v2333_v46, %v3397_v5 }
 0x97c   :  { %v1347_v16 = vpop.xlane.xlu1 %1346 }
 0x97d   :  { %v1866_v15 = vperm.slane %v1347_v16, %v3193_v40 }
 0x97f   :  { %v1867_v48 = vsel %vm1811_vm14, %v1866_v15, %v1865_v62  ;;  %v1227_v62 = vmul.f32 %v2305_v30, %v3246_v23  ;;  %v1880_v30 = vperm.slane %v3326_v0, %v3315_v31  ;;  %v2317_v0 = vunpack.c.h.bf16 %v3365_v44 }
 0x980   :  { %v1869_v19 = vsel %vm1815_vm15, %v1868_v35, %v1867_v48  ;;  %1514 = vadd.xlane.f32.xlu2 %v1513_v53  ;;  %1529 = vadd.xlane.f32.xlu0 %v1528_v18  ;;  %v1537_v35 = vsel %vm87_vm0, %v1243_v59, 0.0  ;;  %v1246_v48 = vmul.f32 %v2344_v12, %v3397_v5  ;;  %v3487_v18 = vld [vmem:[%s4023_s3 + $0x150] sm:$0xff]  }
 0x981   :  { %1481 = vadd.xlane.f32.xlu1 %v1480_v41  ;;  %v1871_v4 = vsel %vm1819_vm1, %v1870_v58, %v1869_v19  ;;  %v1489_v49 = vsel %vm87_vm0, %v1227_v62, 0.0  ;;  %v1230_v19 = vmul.f32 %v2312_v38, %v3246_v23  ;;  %v3493_v41 = vld [vmem:[%s4023_s3 + $0x160] sm:$0xff]   ;;  %v2471_v12 = vld [vmem:[%s4023_s3 + $0x170] sm:$0xff]  }
 0x982   :  { %v2349_v62 = vunpack.c.h.bf16 %v3493_v41 }
 0x983   :  { %v1389_v22 = vpop.xlane.xlu2 %1388  ;;  %v3451_v9 = vpop.xlane.xlu0 %1403  ;;  %v1498_v59 = vsel %vm87_vm0, %v1230_v19, 0.0 }
 0x984   :  { %v1893_v61 = vperm.slane %v1389_v22, %v3159_v24  ;;  %v1356_v43 = vpop.xlane.xlu1 %1355  ;;  %v1882_v22 = vperm.slane %v3384_v26, %v3318_v21 }
 0x985   :  { %v1872_v32 = vperm.slane %v1356_v43, %v3252_v55 }
 0x986   :  { %v3464_v37 = vsel %vm1803_vm12, %v1893_v61, %v1892_v29  ;;  %v1546_v29 = vsel %vm87_vm0, %v1246_v48, 0.0  ;;  %v2340_v61 = vunpack.c.l.bf16 %v3487_v18 }
 0x987   :  { %v1873_v16 = vsel %vm1823_vm2, %v1872_v32, %v1871_v4  ;;  %v1531_v4 = vsel %vm87_vm0, %v1241_v45, 0.0  ;;  %v2356_v45 = vunpack.c.l.bf16 %v2471_v12 }
 0x988   :  { %v1875_v15 = vsel %vm1827_vm3, %v1874_v51, %v1873_v16  ;;  %1523 = vadd.xlane.f32.xlu2 %v1522_v17  ;;  %1538 = vadd.xlane.f32.xlu0 %v1537_v35  ;;  %v1244_v51 = vmul.f32 %v2340_v61, %v3397_v5  ;;  %v1249_v16 = vmul.f32 %v2349_v62, %v3397_v5  ;;  %v2345_v35 = vunpack.c.h.bf16 %v3458_v3 }
 0x989   :  { %1490 = vadd.xlane.f32.xlu1 %v1489_v49  ;;  %v1877_v6 = vsel %vm1831_vm4, %v1876_v10, %v1875_v15  ;;  %v1233_v17 = vmul.f32 %v2317_v0, %v3246_v23  ;;  %v1886_v15 = vperm.slane %v3358_v63, %v3350_v2  ;;  %v1888_v49 = vperm.slane %v3414_v42, %v3353_v34 }
 0x98a   :  { %v1247_v42 = vmul.f32 %v2345_v35, %v3397_v5 }
 0x98b   :  { %v3478_v58 = vpop.xlane.xlu2 %1397  ;;  %v3481_v53 = vpop.xlane.xlu0 %1412  ;;  %v1507_v19 = vsel %vm87_vm0, %v1233_v17, 0.0 }
 0x98c   :  { %v1365_v54 = vpop.xlane.xlu1 %1364  ;;  %v1549_v62 = vsel %vm87_vm0, %v1247_v42, 0.0 }
 0x98d   :  { %v1878_v60 = vperm.slane %v1365_v54, %v3284_v36  ;;  %v1555_v54 = vsel %vm87_vm0, %v1249_v16, 0.0  ;;  %v2329_v16 = vunpack.c.h.bf16 %v3420_v8 }
 0x98f   :  { %v1879_v57 = vsel %vm1835_vm11, %v1878_v60, %v1877_v6  ;;  %v1540_v6 = vsel %vm87_vm0, %v1244_v51, 0.0  ;;  %v2324_v60 = vunpack.c.l.bf16 %v3370_v52 }
 0x990   :  { %v1881_v43 = vsel %vm1839_vm10, %v1880_v30, %v1879_v57  ;;  %1532 = vadd.xlane.f32.xlu2 %v1531_v4  ;;  %1547 = vadd.xlane.f32.xlu0 %v1546_v29  ;;  %v3537_v30 = vld [vmem:[%s4023_s3 + $0x168] sm:$0xff]   ;;  %v1252_v57 = vmul.f32 %v2356_v45, %v3397_v5  ;;  %v3546_v29 = vld [vmem:[%s4023_s3 + $0x178] sm:$0xff]  }
 0x991   :  { %1499 = vadd.xlane.f32.xlu1 %v1498_v59  ;;  %v1883_v32 = vsel %vm1843_vm9, %v1882_v22, %v1881_v43  ;;  %v1236_v52 = vmul.f32 %v2324_v60, %v3246_v23  ;;  %v2352_v43 = vunpack.c.l.bf16 %v3537_v30  ;;  %v2361_v0 = vunpack.c.h.bf16 %v3546_v29 }
 0x992   :  { %v1564_v51 = vsel %vm87_vm0, %v1252_v57, 0.0 }
 0x993   :  { %v3508_v26 = vpop.xlane.xlu2 %1406  ;;  %v3511_v46 = vpop.xlane.xlu0 %1421  ;;  %v1250_v17 = vmul.f32 %v2352_v43, %v3397_v5  ;;  %v3601_v43 = vld [vmem:[%s4023_s3 + $0x190] sm:$0xff]  }
 0x994   :  { %v1374_v10 = vpop.xlane.xlu1 %1373 }
 0x995   :  { %v1884_v44 = vperm.slane %v1374_v10, %v3322_v27  ;;  %v1516_v10 = vsel %vm87_vm0, %v1236_v52, 0.0  ;;  %v1558_v45 = vsel %vm87_vm0, %v1250_v17, 0.0  ;;  %v2373_v17 = vunpack.c.h.bf16 %v3601_v43 }
 0x997   :  { %v1885_v38 = vsel %vm1847_vm8, %v1884_v44, %v1883_v32 }
 0x998   :  { %v1887_v48 = vsel %vm1851_vm7, %v1886_v15, %v1885_v38  ;;  %1541 = vadd.xlane.f32.xlu2 %v1540_v6  ;;  %1556 = vadd.xlane.f32.xlu0 %v1555_v54  ;;  %v3570_v38 = vld [vmem:[%s4023_s3 + $0x188] sm:$0xff]   ;;  %v1897_v6 = vperm.slane %v3422_v13, %v3193_v40  ;;  %v2336_v13 = vunpack.c.l.bf16 %v3429_v39 }
 0x999   :  { %1508 = vadd.xlane.f32.xlu1 %v1507_v19  ;;  %v1889_v63 = vsel %vm1855_vm6, %v1888_v49, %v1887_v48  ;;  %v1255_v49 = vmul.f32 %v2361_v0, %v3397_v5  ;;  %v1899_v48 = vperm.slane %v3478_v58, %v3215_v1  ;;  %v2357_v19 = vunpack.c.h.bf16 %v2471_v12  ;;  %v3592_v12 = vld [vmem:[%s4023_s3 + $0x180] sm:$0xff]  }
 0x99a   :  { %v1242_v39 = vmul.f32 %v2336_v13, %v3397_v5  ;;  %v2364_v0 = vunpack.c.l.bf16 %v3592_v12 }
 0x99b   :  { %v3531_v3 = vpop.xlane.xlu2 %1415  ;;  %v3539_v4 = vpop.xlane.xlu0 %1430 }
 0x99c   :  { %v1383_v22 = vpop.xlane.xlu1 %1382 }
 0x99d   :  { %v1890_v61 = vperm.slane %v1383_v22, %v3403_v28 }
 0x99f   :  { %v1891_v59 = vsel %vm4038_vm13, %v1890_v61, %v1889_v63  ;;  %v1573_v63 = vsel %vm87_vm0, %v1255_v49, 0.0 }
 0x9a0   :  { %v3555_v32 = vsel %vm279_vm5, %v1891_v59, %v3433_v56  ;;  %1550 = vadd.xlane.f32.xlu2 %v1549_v62  ;;  %1565 = vadd.xlane.f32.xlu0 %v1564_v51  ;;  %v1239_v56 = vmul.f32 %v2329_v16, %v3246_v23  ;;  %vm4039_vm5 = vcmask 195712   ;;  %v2368_v23 = vunpack.c.l.bf16 %v3570_v38 }
 0x9a1   :  { %1517 = vadd.xlane.f32.xlu1 %v1516_v10  ;;  %v1903_v62 = vperm.slane %v3451_v9, %v3252_v55  ;;  %v1905_v51 = vperm.slane %v3508_v26, %v3255_v7  ;;  %v2341_v9 = vunpack.c.h.bf16 %v3487_v18  ;;  %v2477_v18 = vld [vmem:[%s4023_s3 + $0x1a0] sm:$0xff]  }
 0x9a2   :  { %v1525_v42 = vsel %vm87_vm0, %v1239_v56, 0.0  ;;  %v1258_v61 = vmul.f32 %v2368_v23, %v3057_v50  ;;  %v1534_v56 = vsel %vm87_vm0, %v1242_v39, 0.0  ;;  %v2380_v39 = vunpack.c.l.bf16 %v2477_v18 }
 0x9a3   :  { %v3561_v44 = vpop.xlane.xlu2 %1424  ;;  %v3563_v15 = vpop.xlane.xlu0 %1439 }
 0x9a4   :  { %v1392_v35 = vpop.xlane.xlu1 %1391  ;;  %v1582_v49 = vsel %vm87_vm0, %v1258_v61, 0.0 }
 0x9a5   :  { %v1895_v8 = vperm.slane %v1392_v35, %v3162_v20 }
 0x9a7   :  { %v1896_v54 = vsel %vm4039_vm5, %v1895_v8, %v3464_v37  ;;  %v1253_v37 = vmul.f32 %v2357_v19, %v3397_v5  ;;  %v1245_v19 = vmul.f32 %v2341_v9, %v3397_v5  ;;  %vm4040_vm5 = vcmask 1042434  }
 0x9a8   :  { %v1898_v60 = vsel %vm1811_vm14, %v1897_v6, %v1896_v54  ;;  %1559 = vadd.xlane.f32.xlu2 %v1558_v45  ;;  %1574 = vadd.xlane.f32.xlu0 %v1573_v63  ;;  %v1256_v6 = vmul.f32 %v2364_v0, %v3057_v50  ;;  %v1261_v45 = vmul.f32 %v2373_v17, %v3057_v50  ;;  %v2369_v63 = vunpack.c.h.bf16 %v3570_v38 }
 0x9a9   :  { %1526 = vadd.xlane.f32.xlu1 %v1525_v42  ;;  %v1900_v22 = vsel %vm1815_vm15, %v1899_v48, %v1898_v60  ;;  %v1567_v16 = vsel %vm87_vm0, %v1253_v37, 0.0  ;;  %v1909_v60 = vperm.slane %v3481_v53, %v3284_v36  ;;  %v1911_v42 = vperm.slane %v3531_v3, %v3315_v31 }
 0x9aa   :  { %v1591_v37 = vsel %vm87_vm0, %v1261_v45, 0.0  ;;  %v1543_v61 = vsel %vm87_vm0, %v1245_v19, 0.0  ;;  %v1259_v3 = vmul.f32 %v2369_v63, %v3057_v50 }
 0x9ab   :  { %v3586_v58 = vpop.xlane.xlu2 %1433  ;;  %v3594_v57 = vpop.xlane.xlu0 %1448 }
 0x9ac   :  { %v1401_v52 = vpop.xlane.xlu1 %1400 }
 0x9ad   :  { %v1901_v59 = vperm.slane %v1401_v52, %v3218_v47 }
 0x9af   :  { %v1902_v10 = vsel %vm1819_vm1, %v1901_v59, %v1900_v22  ;;  %v1576_v22 = vsel %vm87_vm0, %v1256_v6, 0.0  ;;  %v2348_v59 = vunpack.c.l.bf16 %v3493_v41 }
 0x9b0   :  { %v1904_v35 = vsel %vm1823_vm2, %v1903_v62, %v1902_v10  ;;  %1568 = vadd.xlane.f32.xlu2 %v1567_v16  ;;  %1583 = vadd.xlane.f32.xlu0 %v1582_v49  ;;  %v3646_v62 = vld [vmem:[%s4023_s3 + $0x198] sm:$0xff]   ;;  %v1264_v10 = vmul.f32 %v2380_v39, %v3057_v50  ;;  %v3655_v16 = vld [vmem:[%s4023_s3 + $0x1a8] sm:$0xff]  }
 0x9b1   :  { %1535 = vadd.xlane.f32.xlu1 %v1534_v56  ;;  %v1906_v8 = vsel %vm1827_vm3, %v1905_v51, %v1904_v35  ;;  %v1248_v41 = vmul.f32 %v2348_v59, %v3397_v5  ;;  %v1915_v35 = vperm.slane %v3511_v46, %v3322_v27  ;;  %v2376_v49 = vunpack.c.l.bf16 %v3646_v62 }
 0x9b2   :  { %v1917_v56 = vperm.slane %v3561_v44, %v3350_v2  ;;  %v2385_v6 = vunpack.c.h.bf16 %v3655_v16  ;;  %v2353_v46 = vunpack.c.h.bf16 %v3537_v30  ;;  %v1143_v44 = vrot.slane %v2906_v14, 7  ;;  %v3682_v30 = vld [vmem:[%s4023_s3 + $0x1c0] sm:$0xff]  }
 0x9b3   :  { %v3617_v26 = vpop.xlane.xlu2 %1442  ;;  %v3621_v48 = vpop.xlane.xlu0 %1457  ;;  %v1552_v19 = vsel %vm87_vm0, %v1248_v41, 0.0  ;;  %v1262_v63 = vmul.f32 %v2376_v49, %v3057_v50  ;;  %v1921_v14 = vperm.slane %v3539_v4, %v3403_v28 }
 0x9b4   :  { %v1410_v54 = vpop.xlane.xlu1 %1409  ;;  %v3687_v39 = vperm.slane %v1143_v44, 0 }
 0x9b5   :  { %v1907_v23 = vperm.slane %v1410_v54, %v3281_v25  ;;  %v1600_v54 = vsel %vm87_vm0, %v1264_v10, 0.0 }
 0x9b7   :  { %v1908_v13 = vsel %vm1831_vm4, %v1907_v23, %v1906_v8  ;;  %v1585_v8 = vsel %vm87_vm0, %v1259_v3, 0.0  ;;  %v2397_v3 = vunpack.c.h.bf16 %v3682_v30 }
 0x9b8   :  { %v1910_v52 = vsel %vm1835_vm11, %v1909_v60, %v1908_v13  ;;  %1577 = vadd.xlane.f32.xlu2 %v1576_v22  ;;  %1592 = vadd.xlane.f32.xlu0 %v1591_v37  ;;  %v1267_v22 = vmul.f32 %v2385_v6, %v3057_v50  ;;  %v1251_v37 = vmul.f32 %v2353_v46, %v3397_v5 }
 0x9b9   :  { %1544 = vadd.xlane.f32.xlu1 %v1543_v61  ;;  %v1912_v53 = vsel %vm1839_vm10, %v1911_v42, %v1910_v52  ;;  %v2381_v61 = vunpack.c.h.bf16 %v2477_v18  ;;  %v1273_v49 = vmul.f32 %v2397_v3, %v3687_v39 }
 0x9ba   :  { %v1609_v10 = vsel %vm87_vm0, %v1267_v22, 0.0  ;;  %v1561_v41 = vsel %vm87_vm0, %v1251_v37, 0.0 }
 0x9bb   :  { %v3640_v38 = vpop.xlane.xlu2 %1451  ;;  %v3648_v0 = vpop.xlane.xlu0 %1466  ;;  %v1265_v18 = vmul.f32 %v2381_v61, %v3057_v50 }
 0x9bc   :  { %v1419_v51 = vpop.xlane.xlu1 %1418 }
 0x9bd   :  { %v1913_v17 = vperm.slane %v1419_v51, %v3318_v21 }
 0x9bf   :  { %v1914_v9 = vsel %vm1843_vm9, %v1913_v17, %v1912_v53  ;;  %v1594_v53 = vsel %vm87_vm0, %v1262_v63, 0.0  ;;  %v2360_v17 = vunpack.c.l.bf16 %v3546_v29  ;;  %v1923_v29 = vperm.slane %v3586_v58, %v2702_v33  ;;  %v2530_v58 = vld [vmem:[%s4023_s3 + $0x1b0] sm:$0xff]  }
 0x9c0   :  { %v1916_v45 = vsel %vm1847_vm8, %v1915_v35, %v1914_v9  ;;  %1586 = vadd.xlane.f32.xlu2 %v1585_v8  ;;  %1601 = vadd.xlane.f32.xlu0 %v1600_v54  ;;  %v1603_v54 = vsel %vm87_vm0, %v1265_v18, 0.0 }
 0x9c1   :  { %1553 = vadd.xlane.f32.xlu1 %v1552_v19  ;;  %v1918_v23 = vsel %vm1851_vm7, %v1917_v56, %v1916_v45  ;;  %v1254_v8 = vmul.f32 %v2360_v17, %v3397_v5  ;;  %v1926_v45 = vperm.slane %v3563_v15, %v3162_v20  ;;  %v1928_v19 = vperm.slane %v3617_v26, %v3193_v40 }
 0x9c2   :  { %v1627_v5 = vsel %vm87_vm0, %v1273_v49, 0.0 }
 0x9c3   :  { %v3672_v60 = vpop.xlane.xlu2 %1460  ;;  %v3675_v42 = vpop.xlane.xlu0 %1475  ;;  %v1570_v63 = vsel %vm87_vm0, %v1254_v8, 0.0 }
 0x9c4   :  { %v1428_v13 = vpop.xlane.xlu1 %1427 }
 0x9c5   :  { %v1919_v52 = vperm.slane %v1428_v13, %v3353_v34  ;;  %v2365_v13 = vunpack.c.h.bf16 %v3592_v12 }
 0x9c7   :  { %v1920_v59 = vsel %vm1855_vm6, %v1919_v52, %v1918_v23  ;;  %v2388_v23 = vunpack.c.l.bf16 %v2530_v58  ;;  %v3733_v52 = vld [vmem:[%s4023_s3 + $0x1c8] sm:$0xff]   ;;  %v1257_v12 = vmul.f32 %v2365_v13, %v3057_v50 }
 0x9c8   :  { %v1922_v51 = vsel %vm4038_vm13, %v1921_v14, %v1920_v59  ;;  %1595 = vadd.xlane.f32.xlu2 %v1594_v53  ;;  %1610 = vadd.xlane.f32.xlu0 %v1609_v10  ;;  %v3742_v53 = vld [vmem:[%s4023_s3 + $0x1d8] sm:$0xff]   ;;  %v2400_v10 = vunpack.c.l.bf16 %v3733_v52  ;;  %v3768_v58 = vld [vmem:[%s4023_s3 + $0x1e8] sm:$0xff]  }
 0x9c9   :  { %v3698_v4 = vsel %vm4040_vm5, %v1922_v51, %v3555_v32  ;;  %1562 = vadd.xlane.f32.xlu1 %v1561_v41  ;;  %v2483_v32 = vld [vmem:[%s4023_s3 + $0x1d0] sm:$0xff]   ;;  %vm4041_vm5 = vcmask 195712   ;;  %v1268_v37 = vmul.f32 %v2388_v23, %v3057_v50  ;;  %v1932_v51 = vperm.slane %v3594_v57, %v3218_v47 }
 0x9ca   :  { %v2404_v15 = vunpack.c.l.bf16 %v2483_v32  ;;  %v1934_v41 = vperm.slane %v3640_v38, %v3252_v55  ;;  %v2409_v49 = vunpack.c.h.bf16 %v3742_v53  ;;  %v2372_v57 = vunpack.c.l.bf16 %v3601_v43 }
 0x9cb   :  { %v3701_v35 = vpop.xlane.xlu2 %1469  ;;  %v3704_v56 = vpop.xlane.xlu0 %1484  ;;  %v1612_v18 = vsel %vm87_vm0, %v1268_v37, 0.0  ;;  %v1938_v23 = vperm.slane %v3621_v48, %v3281_v25 }
 0x9cc   :  { %v1437_v9 = vpop.xlane.xlu1 %1436  ;;  %v1276_v59 = vmul.f32 %v2404_v15, %v3687_v39 }
 0x9cd   :  { %v1924_v6 = vperm.slane %v1437_v9, %v3159_v24 }
 0x9ce   :  { %v1636_v8 = vsel %vm87_vm0, %v1276_v59, 0.0 }
 0x9cf   :  { %v1925_v46 = vsel %vm1803_vm12, %v1924_v6, %v1923_v29  ;;  %v1579_v29 = vsel %vm87_vm0, %v1257_v12, 0.0  ;;  %v2377_v12 = vunpack.c.h.bf16 %v3646_v62  ;;  %v3798_v62 = vld [vmem:[%s4023_s3 + $0x1f0] sm:$0xff]  }
 0x9d0   :  { %v1927_v44 = vsel %vm4041_vm5, %v1926_v45, %v1925_v46  ;;  %1604 = vadd.xlane.f32.xlu2 %v1603_v54  ;;  %1628 = vadd.xlane.f32.xlu0 %v1627_v5  ;;  %v1274_v45 = vmul.f32 %v2400_v10, %v3687_v39  ;;  %v1279_v46 = vmul.f32 %v2409_v49, %v3687_v39 }
 0x9d1   :  { %1571 = vadd.xlane.f32.xlu1 %v1570_v63  ;;  %v1929_v26 = vsel %vm1811_vm14, %v1928_v19, %v1927_v44  ;;  %v1260_v5 = vmul.f32 %v2372_v57, %v3057_v50  ;;  %v2405_v44 = vunpack.c.h.bf16 %v2483_v32  ;;  %v1940_v63 = vperm.slane %v3672_v60, %v3284_v36 }
 0x9d2   :  { %v1630_v13 = vsel %vm87_vm0, %v1274_v45, 0.0  ;;  %v1944_v49 = vperm.slane %v3648_v0, %v3318_v21  ;;  %v2384_v0 = vunpack.c.l.bf16 %v3655_v16 }
 0x9d3   :  { %v3727_v22 = vpop.xlane.xlu2 %1478  ;;  %v3735_v14 = vpop.xlane.xlu0 %1493  ;;  %v1588_v59 = vsel %vm87_vm0, %v1260_v5, 0.0  ;;  %v1277_v60 = vmul.f32 %v2405_v44, %v3687_v39 }
 0x9d4   :  { %v1446_v61 = vpop.xlane.xlu1 %1445 }
 0x9d5   :  { %v1930_v3 = vperm.slane %v1446_v61, %v3215_v1  ;;  %v1645_v61 = vsel %vm87_vm0, %v1279_v46, 0.0 }
 0x9d7   :  { %v1931_v17 = vsel %vm1815_vm15, %v1930_v3, %v1929_v26  ;;  %v2416_v26 = vunpack.c.l.bf16 %v3768_v58 }
 0x9d8   :  { %v1933_v9 = vsel %vm1819_vm1, %v1932_v51, %v1931_v17  ;;  %1613 = vadd.xlane.f32.xlu2 %v1612_v18  ;;  %1637 = vadd.xlane.f32.xlu0 %v1636_v8  ;;  %v3793_v17 = vld [vmem:[%s4023_s3 + $0x1e0] sm:$0xff]   ;;  %v1946_v8 = vperm.slane %v3701_v35, %v3322_v27 }
 0x9d9   :  { %1580 = vadd.xlane.f32.xlu1 %v1579_v29  ;;  %v1935_v6 = vsel %vm1823_vm2, %v1934_v41, %v1933_v9  ;;  %v1282_v10 = vmul.f32 %v2416_v26, %v3687_v39  ;;  %v1263_v41 = vmul.f32 %v2377_v12, %v3057_v50  ;;  %v1639_v9 = vsel %vm87_vm0, %v1277_v60, 0.0 }
 0x9da   :  { %v2412_v57 = vunpack.c.l.bf16 %v3793_v17  ;;  %v1950_v26 = vperm.slane %v3675_v42, %v3353_v34 }
 0x9db   :  { %v3758_v38 = vpop.xlane.xlu2 %1487  ;;  %v3761_v54 = vpop.xlane.xlu0 %1502  ;;  %v1597_v46 = vsel %vm87_vm0, %v1263_v41, 0.0  ;;  %v2396_v41 = vunpack.c.l.bf16 %v3682_v30 }
 0x9dc   :  { %v1455_v19 = vpop.xlane.xlu1 %1454  ;;  %v1957_v30 = vperm.slane %v3758_v38, %v3162_v20 }
 0x9dd   :  { %v1936_v43 = vperm.slane %v1455_v19, %v3255_v7  ;;  %v1654_v19 = vsel %vm87_vm0, %v1282_v10, 0.0 }
 0x9df   :  { %v1937_v15 = vsel %vm1827_vm3, %v1936_v43, %v1935_v6  ;;  %v2420_v6 = vunpack.c.l.bf16 %v3798_v62  ;;  %v1280_v43 = vmul.f32 %v2412_v57, %v3687_v39 }
 0x9e0   :  { %v1939_v37 = vsel %vm1831_vm4, %v1938_v23, %v1937_v15  ;;  %1631 = vadd.xlane.f32.xlu2 %v1630_v13  ;;  %1646 = vadd.xlane.f32.xlu0 %v1645_v61  ;;  %v1266_v15 = vmul.f32 %v2384_v0, %v3057_v50  ;;  %v2480_v13 = vld [vmem:[%s4023_s3 + $0x1b8] sm:$0xff]   ;;  %v1952_v61 = vperm.slane %v3727_v22, %v3403_v28 }
 0x9e1   :  { %1589 = vadd.xlane.f32.xlu1 %v1588_v59  ;;  %v1941_v48 = vsel %vm1835_vm11, %v1940_v63, %v1939_v37  ;;  %v1284_v63 = vmul.f32 %v2420_v6, %v3687_v39  ;;  %v2417_v37 = vunpack.c.h.bf16 %v3768_v58  ;;  %v1648_v12 = vsel %vm87_vm0, %v1280_v43, 0.0 }
 0x9e2   :  { %v1606_v10 = vsel %vm87_vm0, %v1266_v15, 0.0  ;;  %v3858_v15 = vld [vmem:[%s4023_s3 + $0x1f8] sm:$0xff]   ;;  %s2561_s3 = smov [#allocation2]  }
 0x9e3   :  { %v3784_v32 = vpop.xlane.xlu2 %1496  ;;  %v3786_v3 = vpop.xlane.xlu0 %1511  ;;  %v1283_v22 = vmul.f32 %v2417_v37, %v3687_v39  ;;  %s2092_s11 = sshll.u32 %s2561_s3, 4  ;;  %s2093_s11 = int_to_ptr.vmem [resolvable:$true] %s2092_s11 }
 0x9e4   :  { %v1464_v51 = vpop.xlane.xlu1 %1463 }
 0x9e5   :  { %v1942_v18 = vperm.slane %v1464_v51, %v3315_v31  ;;  %v1660_v51 = vsel %vm87_vm0, %v1284_v63, 0.0 }
 0x9e7   :  { %v1943_v29 = vsel %vm1839_vm10, %v1942_v18, %v1941_v48  ;;  %v2393_v48 = vunpack.c.h.bf16 %v2480_v13 }
 0x9e8   :  { %v1945_v45 = vsel %vm1843_vm9, %v1944_v49, %v1943_v29  ;;  %1640 = vadd.xlane.f32.xlu2 %v1639_v9  ;;  %1655 = vadd.xlane.f32.xlu0 %v1654_v19  ;;  %v1272_v9 = vmul.f32 %v2396_v41, %v3687_v39  ;;  %v2392_v19 = vunpack.c.l.bf16 %v2480_v13 }
 0x9e9   :  { %1598 = vadd.xlane.f32.xlu1 %v1597_v46  ;;  %v1947_v5 = vsel %vm1847_vm8, %v1946_v8, %v1945_v45  ;;  %v1271_v49 = vmul.f32 %v2393_v48, %v3057_v50  ;;  %v1955_v8 = vperm.slane %v3704_v56, %v3159_v24  ;;  %v1657_v45 = vsel %vm87_vm0, %v1283_v22, 0.0 }
 0x9ea   :  { %v1624_v0 = vsel %vm87_vm0, %v1272_v9, 0.0  ;;  %v2401_v56 = vunpack.c.h.bf16 %v3733_v52  ;;  %v1270_v38 = vmul.f32 %v2392_v19, %v3057_v50  ;;  %v1961_v52 = vperm.slane %v3735_v14, %v3215_v1 }
 0x9eb   :  { %v3814_v35 = vpop.xlane.xlu2 %1505  ;;  %v3817_v23 = vpop.xlane.xlu0 %1520  ;;  %v1621_v46 = vsel %vm87_vm0, %v1271_v49, 0.0 }
 0x9ec   :  { %v1473_v44 = vpop.xlane.xlu1 %1472  ;;  %v1275_v63 = vmul.f32 %v2401_v56, %v3687_v39  ;;  %v1618_v37 = vsel %vm87_vm0, %v1270_v38, 0.0  ;;  %v1969_v49 = vperm.slane %v3814_v35, %v3281_v25 }
 0x9ed   :  { %v1948_v16 = vperm.slane %v1473_v44, %v3350_v2 }
 0x9ee   :  { %v1633_v48 = vsel %vm87_vm0, %v1275_v63, 0.0 }
 0x9ef   :  { %v1949_v59 = vsel %vm1851_vm7, %v1948_v16, %v1947_v5 }
 0x9f0   :  { %v1951_v60 = vsel %vm1855_vm6, %v1950_v26, %v1949_v59  ;;  %1649 = vadd.xlane.f32.xlu2 %v1648_v12  ;;  %1661 = vadd.xlane.f32.xlu0 %v1660_v51  ;;  %v1963_v26 = vperm.slane %v3784_v32, %v3218_v47 }
 0x9f1   :  { %v1953_v42 = vsel %vm4038_vm13, %v1952_v61, %v1951_v60  ;;  %1607 = vadd.xlane.f32.xlu1 %v1606_v10  ;;  %vm4042_vm13 = vcmask 1043459   ;;  %v2424_v61 = vunpack.c.l.bf16 %v3858_v15 }
 0x9f2   :  { %v2080_v16 = vsel %vm4042_vm13, %v1953_v42, %v3698_v4  ;;  %v2408_v4 = vunpack.c.l.bf16 %v3742_v53  ;;  %vm4043_vm13 = vcmask 1048512  }
 0x9f3   :  { %v3837_v58 = vpop.xlane.xlu2 %1514  ;;  %v1530_v57 = vpop.xlane.xlu0 %1529  ;;  %v1286_v32 = vmul.f32 %v2424_v61, %v3687_v39  ;;  %v1615_v61 = vsel %vm87_vm0, %v3065_v11, 0.0  ;;  %v2425_v11 = vunpack.c.h.bf16 %v3858_v15 }
 0x9f4   :  { %v1482_v18 = vpop.xlane.xlu1 %1481  ;;  %v1985_v51 = vperm.slane %v1530_v57, %v2702_v33  ;;  %v1278_v42 = vmul.f32 %v2408_v4, %v3687_v39  ;;  %v2413_v57 = vunpack.c.h.bf16 %v3793_v17 }
 0x9f5   :  { %v1954_v29 = vperm.slane %v1482_v18, %v2702_v33  ;;  %v1967_v18 = vperm.slane %v3761_v54, %v3255_v7 }
 0x9f7   :  { %v1956_v6 = vsel %vm1803_vm12, %v1955_v8, %v1954_v29  ;;  %v1666_v8 = vsel %vm87_vm0, %v1286_v32, 0.0 }
 0x9f8   :  { %1658 = vadd.xlane.f32.xlu2 %v1657_v45  ;;  %v1958_v5 = vsel %vm4041_vm5, %v1957_v30, %v1956_v6  ;;  %1622 = vadd.xlane.f32.xlu0 %v1621_v46  ;;  %v1642_v30 = vsel %vm87_vm0, %v1278_v42, 0.0  ;;  %v1281_v46 = vmul.f32 %v2413_v57, %v3687_v39  ;;  %vm4044_vm5 = vcmask 1044484  }
 0x9f9   :  { %1625 = vadd.xlane.f32.xlu1 %v1624_v0  ;;  %v1973_v0 = vperm.slane %v3786_v3, %v3315_v31  ;;  %v1979_v3 = vperm.slane %v3817_v23, %v3350_v2 }
 0x9fa   :  { %v1651_v38 = vsel %vm87_vm0, %v1281_v46, 0.0 }
 0x9fb   :  { %v1524_v43 = vpop.xlane.xlu2 %1523  ;;  %v3870_v59 = vpop.xlane.xlu0 %1538 }
 0x9fc   :  { %v1491_v44 = vpop.xlane.xlu1 %1490 }
 0x9fd   :  { %v1959_v13 = vperm.slane %v1491_v44, %v3193_v40 }
 0x9ff   :  { %v1960_v50 = vsel %vm1811_vm14, %v1959_v13, %v1958_v5  ;;  %v1975_v5 = vperm.slane %v3837_v58, %v3318_v21 }
 0xa00   :  { %v1962_v12 = vsel %vm1815_vm15, %v1961_v52, %v1960_v50  ;;  %1619 = vadd.xlane.f32.xlu2 %v1618_v37  ;;  %v1981_v50 = vperm.slane %v1524_v43, %v3353_v34 }
 0xa01   :  { %1634 = vadd.xlane.f32.xlu1 %v1633_v48  ;;  %v1964_v14 = vsel %vm1819_vm1, %v1963_v26, %v1962_v12  ;;  %v2421_v12 = vunpack.c.h.bf16 %v3798_v62 }
 0xa03   :  { %v1533_v60 = vpop.xlane.xlu2 %1532  ;;  %v1548_v54 = vpop.xlane.xlu0 %1547 }
 0xa04   :  { %v1986_v10 = vperm.slane %v1533_v60, %v3159_v24  ;;  %v1500_v41 = vpop.xlane.xlu1 %1499  ;;  %v1996_v57 = vperm.slane %v1548_v54, %v3252_v55 }
 0xa05   :  { %v1965_v22 = vperm.slane %v1500_v41, %v3252_v55  ;;  %v1287_v41 = vmul.f32 %v2425_v11, %v3687_v39 }
 0xa06   :  { %v1987_v53 = vsel %vm1803_vm12, %v1986_v10, %v1985_v51 }
 0xa07   :  { %v1966_v9 = vsel %vm1823_vm2, %v1965_v22, %v1964_v14  ;;  %v1285_v14 = vmul.f32 %v2421_v12, %v3687_v39  ;;  %v1990_v22 = vperm.slane %v3870_v59, %v3193_v40 }
 0xa08   :  { %v1968_v29 = vsel %vm1827_vm3, %v1967_v18, %v1966_v9  ;;  %1667 = vadd.xlane.f32.xlu2 %v1666_v8 }
 0xa09   :  { %1643 = vadd.xlane.f32.xlu1 %v1642_v30  ;;  %v1970_v6 = vsel %vm1831_vm4, %v1969_v49, %v1968_v29  ;;  %v1663_v10 = vsel %vm87_vm0, %v1285_v14, 0.0  ;;  %v1669_v29 = vsel %vm87_vm0, %v1287_v41, 0.0  ;;  %vm4046_vm0 = vcmask 1048512  }
 0xa0b   :  { %v1542_v45 = vpop.xlane.xlu2 %1541  ;;  %v1557_v13 = vpop.xlane.xlu0 %1556 }
 0xa0c   :  { %v1509_v19 = vpop.xlane.xlu1 %1508  ;;  %v1992_v18 = vperm.slane %v1542_v45, %v3215_v1 }
 0xa0d   :  { %v1971_v35 = vperm.slane %v1509_v19, %v3284_v36 }
 0xa0f   :  { %v1972_v56 = vsel %vm1835_vm11, %v1971_v35, %v1970_v6 }
 0xa10   :  { %v1974_v17 = vsel %vm1839_vm10, %v1973_v0, %v1972_v56 }
 0xa11   :  { %1652 = vadd.xlane.f32.xlu1 %v1651_v38  ;;  %v1976_v44 = vsel %vm1843_vm9, %v1975_v5, %v1974_v17  ;;  %v2002_v5 = vperm.slane %v1557_v13, %v3284_v36 }
 0xa13   :  { %v1551_v63 = vpop.xlane.xlu2 %1550  ;;  %v1566_v32 = vpop.xlane.xlu0 %1565 }
 0xa14   :  { %v1518_v52 = vpop.xlane.xlu1 %1517  ;;  %v1998_v59 = vperm.slane %v1551_v63, %v3255_v7 }
 0xa15   :  { %v1977_v26 = vperm.slane %v1518_v52, %v3322_v27 }
 0xa17   :  { %v1978_v58 = vsel %vm1847_vm8, %v1977_v26, %v1976_v44 }
 0xa18   :  { %v1980_v37 = vsel %vm1851_vm7, %v1979_v3, %v1978_v58  ;;  %v2008_v3 = vperm.slane %v1566_v32, %v3322_v27 }
 0xa19   :  { %1616 = vadd.xlane.f32.xlu1 %v1615_v61  ;;  %v1982_v48 = vsel %vm1855_vm6, %v1981_v50, %v1980_v37 }
 0xa1b   :  { %v1560_v60 = vpop.xlane.xlu2 %1559 }
 0xa1c   :  { %v1527_v4 = vpop.xlane.xlu1 %1526  ;;  %v2004_v56 = vperm.slane %v1560_v60, %v3315_v31 }
 0xa1d   :  { %v1983_v23 = vperm.slane %v1527_v4, %v3403_v28 }
 0xa1f   :  { %v1984_v43 = vsel %vm4043_vm13, %v1983_v23, %v1982_v48  ;;  %vm4045_vm13 = vcmask 195712  }
 0xa20   :  { %v3916_v51 = vsel %vm4044_vm5, %v1984_v43, %v2080_v16  ;;  %v1575_v16 = vpop.xlane.xlu0 %1574  ;;  %vm4047_vm5 = vcmask 1045509  }
 0xa21   :  { %1664 = vadd.xlane.f32.xlu1 %v1663_v10  ;;  %v2014_v4 = vperm.slane %v1575_v16, %v3403_v28 }
 0xa23   :  { %v1569_v49 = vpop.xlane.xlu2 %1568 }
 0xa24   :  { %v1536_v62 = vpop.xlane.xlu1 %1535  ;;  %v2010_v50 = vperm.slane %v1569_v49, %v3350_v2 }
 0xa25   :  { %v1988_v42 = vperm.slane %v1536_v62, %v3162_v20 }
 0xa27   :  { %v1989_v9 = vsel %vm4045_vm13, %v1988_v42, %v1987_v53 }
 0xa28   :  { %v1991_v8 = vsel %vm1811_vm14, %v1990_v22, %v1989_v9  ;;  %v1584_v46 = vpop.xlane.xlu0 %1583 }
 0xa29   :  { %1670 = vadd.xlane.f32.xlu1 %v1669_v29  ;;  %v1993_v15 = vsel %vm1815_vm15, %v1992_v18, %v1991_v8 }
 0xa2b   :  { %v1578_v53 = vpop.xlane.xlu2 %1577 }
 0xa2c   :  { %v1545_v30 = vpop.xlane.xlu1 %1544  ;;  %v2016_v43 = vperm.slane %v1578_v53, %v2702_v33 }
 0xa2d   :  { %v1994_v39 = vperm.slane %v1545_v30, %v3218_v47 }
 0xa2f   :  { %v1995_v6 = vsel %vm1819_vm1, %v1994_v39, %v1993_v15  ;;  %v2019_v39 = vperm.slane %v1584_v46, %v3162_v20 }
 0xa30   :  { %v1997_v45 = vsel %vm1823_vm2, %v1996_v57, %v1995_v6  ;;  %v1593_v63 = vpop.xlane.xlu0 %1592 }
 0xa31   :  { %v1999_v19 = vsel %vm1827_vm3, %v1998_v59, %v1997_v45 }
 0xa33   :  { %v1587_v44 = vpop.xlane.xlu2 %1586 }
 0xa34   :  { %v1554_v35 = vpop.xlane.xlu1 %1553  ;;  %v2021_v53 = vperm.slane %v1587_v44, %v3193_v40 }
 0xa35   :  { %v2000_v0 = vperm.slane %v1554_v35, %v3281_v25 }
 0xa37   :  { %v2001_v17 = vsel %vm1831_vm4, %v2000_v0, %v1999_v19 }
 0xa38   :  { %v2003_v54 = vsel %vm1835_vm11, %v2002_v5, %v2001_v17  ;;  %v1602_v14 = vpop.xlane.xlu0 %1601 }
 0xa39   :  { %v2005_v38 = vsel %vm1839_vm10, %v2004_v56, %v2003_v54  ;;  %v2025_v56 = vperm.slane %v1593_v63, %v3218_v47 }
 0xa3b   :  { %v1596_v12 = vpop.xlane.xlu2 %1595 }
 0xa3c   :  { %v1563_v52 = vpop.xlane.xlu1 %1562 }
 0xa3d   :  { %v2006_v26 = vperm.slane %v1563_v52, %v3318_v21  ;;  %v2027_v52 = vperm.slane %v1596_v12, %v3252_v55 }
 0xa3f   :  { %v2007_v58 = vsel %vm1843_vm9, %v2006_v26, %v2005_v38 }
 0xa40   :  { %v2009_v13 = vsel %vm1847_vm8, %v2008_v3, %v2007_v58  ;;  %v1611_v41 = vpop.xlane.xlu0 %1610  ;;  %v2031_v58 = vperm.slane %v1602_v14, %v3281_v25 }
 0xa41   :  { %v2011_v37 = vsel %vm1851_vm7, %v2010_v50, %v2009_v13 }
 0xa43   :  { %v1605_v11 = vpop.xlane.xlu2 %1604 }
 0xa44   :  { %v1572_v61 = vpop.xlane.xlu1 %1571 }
 0xa45   :  { %v2012_v48 = vperm.slane %v1572_v61, %v3353_v34 }
 0xa47   :  { %v2013_v60 = vsel %vm1855_vm6, %v2012_v48, %v2011_v37 }
 0xa48   :  { %v2015_v23 = vsel %vm4046_vm0, %v2014_v4, %v2013_v60  ;;  %v1629_v18 = vpop.xlane.xlu0 %1628  ;;  %vm4048_vm0 = vmmov %vm4045_vm13 }
 0xa49   :  { %v2082_v59 = vsel %vm4047_vm5, %v2015_v23, %v3916_v51  ;;  %v2048_v54 = vperm.slane %v1629_v18, %v3159_v24 }
 0xa4b   :  { %v1614_v22 = vpop.xlane.xlu2 %1613 }
 0xa4c   :  { %v1581_v32 = vpop.xlane.xlu1 %1580  ;;  %v2039_v18 = vperm.slane %v1614_v22, %v3322_v27 }
 0xa4d   :  { %v2017_v10 = vperm.slane %v1581_v32, %v3159_v24 }
 0xa4f   :  { %v2018_v62 = vsel %vm1803_vm12, %v2017_v10, %v2016_v43  ;;  %v2037_v43 = vperm.slane %v1611_v41, %v3318_v21 }
 0xa50   :  { %v1638_v16 = vpop.xlane.xlu0 %1637  ;;  %v2020_v6 = vsel %vm4045_vm13, %v2019_v39, %v2018_v62 }
 0xa51   :  { %v2022_v0 = vsel %vm1811_vm14, %v2021_v53, %v2020_v6  ;;  %v2054_v61 = vperm.slane %v1638_v16, %v3215_v1 }
 0xa53   :  { %v1632_v9 = vpop.xlane.xlu2 %1631 }
 0xa54   :  { %v1590_v42 = vpop.xlane.xlu1 %1589  ;;  %v2050_v3 = vperm.slane %v1632_v9, %v3162_v20  ;;  %v2033_v20 = vperm.slane %v1605_v11, %v3284_v36 }
 0xa55   :  { %v2023_v45 = vperm.slane %v1590_v42, %v3215_v1 }
 0xa57   :  { %v2024_v5 = vsel %vm1815_vm15, %v2023_v45, %v2022_v0 }
 0xa58   :  { %v1647_v30 = vpop.xlane.xlu0 %1646  ;;  %v2026_v51 = vsel %vm1819_vm1, %v2025_v56, %v2024_v5 }
 0xa59   :  { %v2028_v50 = vsel %vm1823_vm2, %v2027_v52, %v2026_v51  ;;  %v2060_v62 = vperm.slane %v1647_v30, %v3255_v7 }
 0xa5b   :  { %v1641_v15 = vpop.xlane.xlu2 %1640 }
 0xa5c   :  { %v1599_v49 = vpop.xlane.xlu1 %1598  ;;  %v2056_v14 = vperm.slane %v1641_v15, %v3218_v47 }
 0xa5d   :  { %v2029_v38 = vperm.slane %v1599_v49, %v3255_v7 }
 0xa5f   :  { %v2030_v63 = vsel %vm1827_vm3, %v2029_v38, %v2028_v50 }
 0xa60   :  { %v1656_v35 = vpop.xlane.xlu0 %1655  ;;  %v2032_v12 = vsel %vm1831_vm4, %v2031_v58, %v2030_v63 }
 0xa61   :  { %v2034_v23 = vsel %vm1835_vm11, %v2033_v20, %v2032_v12 }
 0xa63   :  { %v1650_v19 = vpop.xlane.xlu2 %1649 }
 0xa64   :  { %v1608_v8 = vpop.xlane.xlu1 %1607  ;;  %v2062_v41 = vperm.slane %v1650_v19, %v3281_v25 }
 0xa68   :  { %v1662_v24 = vpop.xlane.xlu0 %1661 }
 0xa69   :  { %v2070_v5 = vperm.slane %v1662_v24, %v3322_v27 }
 0xa6c   :  { %v1626_v29 = vpop.xlane.xlu1 %1625 }
 0xa6d   :  { %v2047_v46 = vperm.slane %v1626_v29, %v2702_v33  ;;  %v1659_v33 = vpop.xlane.xlu2 %1658 }
 0xa6e   :  { %v2068_v53 = vperm.slane %v1659_v33, %v3318_v21 }
 0xa6f   :  { %v2049_v44 = vsel %vm1803_vm12, %v2048_v54, %v2047_v46  ;;  %vm4049_vm12 = vcmask 1048512  }
 0xa70   :  { %v2051_v13 = vsel %vm4048_vm0, %v2050_v3, %v2049_v44 }
 0xa74   :  { %v1635_v57 = vpop.xlane.xlu1 %1634 }
 0xa75   :  { %v2052_v26 = vperm.slane %v1635_v57, %v3193_v40  ;;  %v2035_v40 = vperm.slane %v1608_v8, %v3315_v31  ;;  %v1620_v42 = vpop.xlane.xlu2 %1619  ;;  %v2066_v57 = vperm.slane %v1656_v35, %v3315_v31 }
 0xa76   :  { %v2043_v8 = vperm.slane %v1620_v42, %v3353_v34 }
 0xa77   :  { %v2053_v37 = vsel %vm1811_vm14, %v2052_v26, %v2051_v13  ;;  %v2036_v32 = vsel %vm1839_vm10, %v2035_v40, %v2034_v23  ;;  %vm4050_vm14 = vcmask 1046534  }
 0xa78   :  { %v2055_v4 = vsel %vm1815_vm15, %v2054_v61, %v2053_v37  ;;  %v2038_v11 = vsel %vm1843_vm9, %v2037_v43, %v2036_v32 }
 0xa79   :  { %v2057_v1 = vsel %vm1819_vm1, %v2056_v14, %v2055_v4  ;;  %v2040_v29 = vsel %vm1847_vm8, %v2039_v18, %v2038_v11 }
 0xa7c   :  { %v1644_v17 = vpop.xlane.xlu1 %1643 }
 0xa7d   :  { %v2058_v60 = vperm.slane %v1644_v17, %v3252_v55  ;;  %v1623_v55 = vpop.xlane.xlu0 %1622  ;;  %v1668_v56 = vpop.xlane.xlu2 %1667 }
 0xa7e   :  { %v2045_v7 = vperm.slane %v1623_v55, %v3403_v28  ;;  %v2074_v31 = vperm.slane %v1668_v56, %v3353_v34 }
 0xa7f   :  { %v2059_v10 = vsel %vm1823_vm2, %v2058_v60, %v2057_v1 }
 0xa80   :  { %v2061_v47 = vsel %vm1827_vm3, %v2060_v62, %v2059_v10 }
 0xa81   :  { %v2063_v22 = vsel %vm1831_vm4, %v2062_v41, %v2061_v47 }
 0xa84   :  { %v1653_v48 = vpop.xlane.xlu1 %1652 }
 0xa85   :  { %v2064_v9 = vperm.slane %v1653_v48, %v3284_v36 }
 0xa87   :  { %v2065_v39 = vsel %vm1835_vm11, %v2064_v9, %v2063_v22 }
 0xa88   :  { %v2067_v6 = vsel %vm1839_vm10, %v2066_v57, %v2065_v39 }
 0xa89   :  { %v2069_v19 = vsel %vm1843_vm9, %v2068_v53, %v2067_v6  ;;  %vm4051_vm9 = vmmov %vm4049_vm12 }
 0xa8a   :  { %v2071_v46 = vsel %vm1847_vm8, %v2070_v5, %v2069_v19  ;;  %vm4052_vm8 = vcmask 1047559  }
 0xa8c   :  { %v1617_v49 = vpop.xlane.xlu1 %1616 }
 0xa8d   :  { %v2041_v16 = vperm.slane %v1617_v49, %v3350_v2 }
 0xa8f   :  { %v2042_v15 = vsel %vm1851_vm7, %v2041_v16, %v2040_v29 }
 0xa90   :  { %v2044_v30 = vsel %vm1855_vm6, %v2043_v8, %v2042_v15 }
 0xa91   :  { %v2046_v36 = vsel %vm4049_vm12, %v2045_v7, %v2044_v30 }
 0xa92   :  { %v2083_v25 = vsel %vm4050_vm14, %v2046_v36, %v2082_v59 }
 0xa94   :  { %v1665_v45 = vpop.xlane.xlu1 %1664 }
 0xa95   :  { %v2072_v0 = vperm.slane %v1665_v45, %v3350_v2 }
 0xa97   :  { %v2073_v17 = vsel %vm1851_vm7, %v2072_v0, %v2071_v46 }
 0xa98   :  { %v2075_v2 = vsel %vm1855_vm6, %v2074_v31, %v2073_v17 }
 0xa9c   :  { %v1671_v35 = vpop.xlane.xlu1 %1670 }
 0xa9d   :  { %v2076_v21 = vperm.slane %v1671_v35, %v3403_v28 }
 0xa9f   :  { %v2077_v27 = vsel %vm4051_vm9, %v2076_v21, %v2075_v2 }
 0xaa0   :  { %v2084_v59 = vsel %vm4052_vm8, %v2077_v27, %v2083_v25 }
 0xaa1   :  { %2086 = vst [vmem:[#allocation2] sm:$0xff] %v2084_v59 }
 0xaa2   :  { %2097 = dma.vmem_to_hbm [thread:$0]  %s2093_s11, 128, %s2095_s2, [#allocation3]  }
 0xaa3   :  { %2555 = dma.done.wait [#allocation3], 128  }
 0xaa4   :  { %2556 = vsyncadd [#allocation3], 4294967168 }
 0xaa5   :  { %2102 = vsyncpa [#allocation3], 1 }

</bundles_post_ra>
